<compile_context>
chip_gen: v7x
topology: tpu7x:2x2x1
jax: 0.10.0
libtpu: 0.0.40
codegen_flags: <defaults>
</compile_context>

<pallas_src>
import functools
import math

import numpy as np
import jax
import jax.numpy as jnp
from jax.experimental import pallas as pl
from jax.experimental.pallas import tpu as pltpu

MASK_VALUE = -1e30                           # causal mask folded into the bias (kernel)
MAX_NEG = -float(np.finfo(np.float32).max)   # torch: -finfo(f32).max (reference only)


# ----------------------------- shared math helpers -----------------------------
def _layernorm(x, g, eps=1e-5, stable=False):
    # DALLE2 LayerNorm: no bias, unbiased=False variance; "stable" divides by amax.
    if stable:
        x = x / jnp.max(x, axis=-1, keepdims=True)
    mean = jnp.mean(x, axis=-1, keepdims=True)
    var = jnp.mean(jnp.square(x - mean), axis=-1, keepdims=True)
    return (x - mean) * jax.lax.rsqrt(var + eps) * g


def _l2norm(x, eps=1e-12):
    n = jnp.sqrt(jnp.sum(x * x, axis=-1, keepdims=True))
    return x / jnp.maximum(n, eps)


# ----------------------------- fused Pallas kernel -----------------------------
def fused_transformer_kernel(
    x_ref, bias_null_ref, bias_main_ref, cos_ref, sin_ref,
    g_attn_ref, wq_ref, wk_ref, wv_ref, nullk_ref, nullv_ref,
    wout_ref, g_out_ref, g_ff_ref, wff_a_ref, wff_g_ref, wff2_ref,
    g_norm_ref, w_proj_ref,
    o_ref,
    *, heads, dim_head, attn_scale):
    layer = pl.program_id(1)
    n_layers = pl.num_programs(1)
    H, DH = heads, dim_head
    half = DH // 2
    sqrt_scale = math.sqrt(attn_scale)
    bf16 = jnp.bfloat16

    # Layer 0 seeds the activation carry.  The output block index is constant along the
    # depth axis, so this VMEM block stays resident across all layers of a batch
    # element and is written back to HBM only once.
    @pl.when(layer == 0)
    def _():
        o_ref[...] = x_ref[...]

    x = o_ref[0]                 # (N, D) f32 carried activation
    cos = cos_ref[...]           # (N, DH) rotary cos table (de-interleaved layout)
    sin = sin_ref[...]           # (N, DH) rotary sin table (sign folded in)

    # ------------------------------- attention -------------------------------
    xn = _layernorm(x, g_attn_ref[0])
    xn16 = xn.astype(bf16)

    # Head-batched q projection: a single dot_general for all heads (bf16 in, f32 acc).
    xn_b = jnp.broadcast_to(xn16[None], (H,) + xn16.shape)             # (H, N, D)
    q = jnp.einsum("hnd,hde->hne", xn_b, wq_ref[0],
                   preferred_element_type=jnp.float32)                 # (H, N, DH)
    k = jnp.dot(xn16, wk_ref[0], preferred_element_type=jnp.float32)   # (N, DH)
    v = jnp.dot(xn16, wv_ref[0], preferred_element_type=jnp.float32)   # (N, DH)

    # Rotary embedding: single lane roll by DH/2 (weights were pre-permuted so the
    # interleaved rotate-half partner of each lane sits DH/2 lanes away).  XLU only.
    q = q * cos + pltpu.roll(q, half, 2) * sin
    k = k * cos + pltpu.roll(k, half, 1) * sin

    # Cosine-sim attention: l2norm then scale by sqrt(16).
    q = _l2norm(q) * sqrt_scale
    k = _l2norm(k) * sqrt_scale
    nk = _l2norm(nullk_ref[0]) * sqrt_scale                            # (1, DH)
    nv = nullv_ref[0]                                                  # (1, DH)

    # Scores for all heads with one batched dot_general contracting the last dims
    # (no k transpose materialized).  Causal mask is pre-folded into bias_main.
    k_b = jnp.broadcast_to(k.astype(bf16)[None], (H,) + k.shape)       # (H, N, DH)
    s_main = jnp.einsum("hqd,hkd->hqk", q.astype(bf16), k_b,
                        preferred_element_type=jnp.float32)            # (H, N, N)
    s_main = s_main + bias_main_ref[...]
    s_null = jnp.sum(q * nk, axis=-1, keepdims=True) + bias_null_ref[...]   # (H, N, 1)

    m = jnp.maximum(jnp.max(s_main, axis=-1, keepdims=True), s_null)
    p_main = jnp.exp(s_main - m)
    p_null = jnp.exp(s_null - m)
    denom = jnp.sum(p_main, axis=-1, keepdims=True) + p_null

    v_b = jnp.broadcast_to(v.astype(bf16)[None], (H,) + v.shape)       # (H, N, DH)
    o = jnp.einsum("hqk,hkd->hqd", p_main.astype(bf16), v_b,
                   preferred_element_type=jnp.float32)                 # (H, N, DH)
    o = (o + p_null * nv) * pl.reciprocal(denom, approx=True)

    # Output projection, batched over heads, then reduce the head axis.
    attn = jnp.einsum("hqd,hde->hqe", o.astype(bf16), wout_ref[0],
                      preferred_element_type=jnp.float32)              # (H, N, D)
    attn = jnp.sum(attn, axis=0)                                       # (N, D)
    attn = _layernorm(attn, g_out_ref[0])                              # to_out[1] LN
    x = x + attn                                                       # residual

    # --------------------------- SwiGLU feed-forward ---------------------------
    xn2 = _layernorm(x, g_ff_ref[0]).astype(bf16)
    a = jnp.dot(xn2, wff_a_ref[0], preferred_element_type=jnp.float32)
    gate = jnp.dot(xn2, wff_g_ref[0], preferred_element_type=jnp.float32)
    hidden = a * (gate * jax.nn.sigmoid(gate))
    y = jnp.dot(hidden.astype(bf16), wff2_ref[0],
                preferred_element_type=jnp.float32)
    x = x + y                                                          # residual

    o_ref[0] = x

    # Fused final stable-LayerNorm + projection on the last layer.
    @pl.when(layer == n_layers - 1)
    def _():
        xf = _layernorm(x, g_norm_ref[...], stable=True).astype(bf16)
        o_ref[0] = jnp.dot(xf, w_proj_ref[...], preferred_element_type=jnp.float32)


# ----------------------------- host-side tables & packing -----------------------------
def compute_rel_pos_bias(i, j, emb, num_buckets=32, max_distance=128):
    # T5-style (causal) relative position buckets, as in DALLE2 RelPosBias.
    q_pos = np.arange(i)
    k_pos = np.arange(j)
    rel = k_pos[None, :] - q_pos[:, None]
    n = np.maximum(-rel, 0)
    max_exact = num_buckets // 2
    is_small = n < max_exact
    val_large = max_exact + (
        np.log(np.maximum(n, 1).astype(np.float32) / max_exact)
        / math.log(max_distance / max_exact) * (num_buckets - max_exact)
    ).astype(np.int32)
    val_large = np.minimum(val_large, num_buckets - 1)
    bucket = np.where(is_small, n, val_large)
    values = jnp.asarray(emb)[bucket]                                  # (i, j, H)
    return jnp.transpose(values, (2, 0, 1)).astype(jnp.float32)        # (H, i, j)


def attn_bias_tables(n, emb):
    """Null-column bias (H, n, 1) and main bias (H, n, n) with causal mask folded in."""
    full = compute_rel_pos_bias(n, n + 1, emb)
    bias_null = full[:, :, :1]
    row = np.arange(n)[:, None]
    col = np.arange(n)[None, :]
    mask = jnp.asarray(np.where(col > row, MASK_VALUE, 0.0).astype(np.float32))
    bias_main = full[:, :, 1:] + mask[None]
    return bias_null, bias_main


def _dh_permutation(dim_head):
    """old-lane-index for each new lane position: interleaved rotary partners end up
    exactly dim_head//2 apart so rotate-half becomes one roll by dim_head//2."""
    rot_dim = min(32, dim_head)
    half = dim_head // 2
    rot_half = rot_dim // 2
    old_for_new = np.zeros(dim_head, dtype=np.int64)
    old_for_new[:rot_half] = 2 * np.arange(rot_half)
    old_for_new[half:half + rot_half] = 2 * np.arange(rot_half) + 1
    rest = np.arange(rot_dim, dim_head)
    n_lo = half - rot_half
    old_for_new[rot_half:half] = rest[:n_lo]
    old_for_new[half + rot_half:] = rest[n_lo:]
    return old_for_new


def kernel_rotary_tables(n, dim_head, theta=10000.0):
    """cos/sin tables in the permuted lane layout with the rotate-half sign folded in."""
    rot_dim = min(32, dim_head)
    half = dim_head // 2
    rot_half = rot_dim // 2
    inv_freq = 1.0 / (theta ** (np.arange(0, rot_dim, 2, dtype=np.float32) / rot_dim))
    ang = np.arange(n, dtype=np.float32)[:, None] * inv_freq[None, :]  # (n, rot_half)
    cos = np.ones((n, dim_head), np.float32)
    sin = np.zeros((n, dim_head), np.float32)
    cos[:, :rot_half] = np.cos(ang)
    cos[:, half:half + rot_half] = np.cos(ang)
    sin[:, :rot_half] = -np.sin(ang)
    sin[:, half:half + rot_half] = np.sin(ang)
    return jnp.asarray(cos), jnp.asarray(sin)


def rotary_tables(n, dim_head, theta=10000.0):
    """Interleaved rotary tables + rotate-half matrix (pure-JAX reference only)."""
    rot_dim = min(32, dim_head)
    inv_freq = 1.0 / (theta ** (np.arange(0, rot_dim, 2, dtype=np.float32) / rot_dim))
    t = np.arange(n, dtype=np.float32)
    freqs = np.einsum("i,j->ij", t, inv_freq)
    freqs = np.repeat(freqs, 2, axis=-1)
    cos = np.ones((n, dim_head), np.float32)
    sin = np.zeros((n, dim_head), np.float32)
    cos[:, :rot_dim] = np.cos(freqs)
    sin[:, :rot_dim] = np.sin(freqs)
    rot = np.zeros((dim_head, dim_head), np.float32)
    for idx in range(rot_dim // 2):
        rot[2 * idx + 1, 2 * idx] = -1.0
        rot[2 * idx, 2 * idx + 1] = 1.0
    return jnp.asarray(cos), jnp.asarray(sin), jnp.asarray(rot)


def pack_params(params, *, dim_head):
    """Stack per-layer weights along a depth axis, pre-permute the rotary lane layout
    of wq/wk/null_k, and cast matmul weights to bf16."""
    perm = _dh_permutation(dim_head)
    layers = params["layers"]

    def stack(key):
        return jnp.stack([p[key] for p in layers], axis=0)

    b16 = lambda a: a.astype(jnp.bfloat16)
    return dict(
        g_attn=stack("g_attn"),
        wq=b16(stack("wq")[..., perm]),
        wk=b16(stack("wk")[..., perm]),
        wv=b16(stack("wv")),
        null_k=stack("null_k")[..., perm],
        null_v=stack("null_v"),
        w_out=b16(stack("w_out")),
        g_out=stack("g_out"),
        g_ff=stack("g_ff"),
        wff_a=b16(stack("wff_a")),
        wff_g=b16(stack("wff_g")),
        wff2=b16(stack("wff2")),
        g_norm=params["g_norm"],
        w_proj=b16(params["w_proj"]),
    )


# ----------------------------- wrapper (single pallas_call) -----------------------------
def flagged_causal_transformer(x, params, *, heads, dim_head):
    B, N, D = x.shape
    H, DH = heads, dim_head
    L = len(params["layers"])
    packed = pack_params(params, dim_head=dim_head)
    F = packed["wff_a"].shape[-1]

    bias_null, bias_main = attn_bias_tables(N, params["rel_pos_emb"])
    cos_t, sin_t = kernel_rotary_tables(N, DH)

    kernel = functools.partial(fused_transformer_kernel,
                               heads=H, dim_head=DH, attn_scale=16.0)

    def const_spec(shape):
        return pl.BlockSpec(shape, lambda b, l: (0,) * len(shape))

    def layer_spec(shape):
        return pl.BlockSpec((1,) + shape, lambda b, l: (l,) + (0,) * len(shape))

    return pl.pallas_call(
        kernel,
        out_shape=jax.ShapeDtypeStruct((B, N, D), jnp.float32),
        grid=(B, L),
        in_specs=[
            pl.BlockSpec((1, N, D), lambda b, l: (b, 0, 0)),   # x
            const_spec((H, N, 1)),                             # bias, null column
            const_spec((H, N, N)),                             # bias + folded causal mask
            const_spec((N, DH)),                               # rotary cos
            const_spec((N, DH)),                               # rotary sin (signed)
            layer_spec((1, D)),                                # g_attn
            layer_spec((H, D, DH)),                            # wq
            layer_spec((D, DH)),                               # wk
            layer_spec((D, DH)),                               # wv
            layer_spec((1, DH)),                               # null_k
            layer_spec((1, DH)),                               # null_v
            layer_spec((H, DH, D)),                            # w_out
            layer_spec((1, D)),                                # g_out
            layer_spec((1, D)),                                # g_ff
            layer_spec((D, F)),                                # wff_a
            layer_spec((D, F)),                                # wff_g
            layer_spec((F, D)),                                # wff2
            const_spec((1, D)),                                # g_norm (final)
            const_spec((D, D)),                                # w_proj (final)
        ],
        out_specs=pl.BlockSpec((1, N, D), lambda b, l: (b, 0, 0)),
        input_output_aliases={0: 0},
        compiler_params=pltpu.CompilerParams(
            dimension_semantics=("parallel", "arbitrary"),
            vmem_limit_bytes=32 * 1024 * 1024,
        ),
    )(x, bias_null, bias_main, cos_t, sin_t,
      packed["g_attn"], packed["wq"], packed["wk"], packed["wv"],
      packed["null_k"], packed["null_v"], packed["w_out"],
      packed["g_out"], packed["g_ff"],
      packed["wff_a"], packed["wff_g"], packed["wff2"],
      packed["g_norm"], packed["w_proj"])


# ----------------------------- params & pure-JAX reference -----------------------------
def init_all_params(seed, *, dim, depth, heads, dim_head, ff_mult, num_buckets=32):
    key = jax.random.PRNGKey(seed)

    def nxt():
        nonlocal key
        key, sub = jax.random.split(key)
        return sub

    def w(shape, scale=0.05):
        return scale * jax.random.normal(nxt(), shape, dtype=jnp.float32)

    def gamma(d):
        return 1.0 + 0.05 * jax.random.normal(nxt(), (1, d), dtype=jnp.float32)

    ff_inner = ff_mult * dim
    layers = []
    for _ in range(depth):
        layers.append(dict(
            g_attn=gamma(dim),
            wq=w((heads, dim, dim_head)),
            wk=w((dim, dim_head)),
            wv=w((dim, dim_head)),
            null_k=w((1, dim_head), scale=1.0),
            null_v=w((1, dim_head), scale=1.0),
            w_out=w((heads, dim_head, dim)),
            g_out=gamma(dim),
            g_ff=gamma(dim),
            wff_a=w((dim, ff_inner)),
            wff_g=w((dim, ff_inner)),
            wff2=w((ff_inner, dim)),
        ))
    return dict(
        layers=layers,
        rel_pos_emb=w((num_buckets, heads), scale=1.0),
        g_norm=gamma(dim),
        w_proj=w((dim, dim)),
    )


def reference_forward(x, params, *, heads, dim_head):
    B, N, D = x.shape
    H = heads
    scale = 16.0
    bias_full = compute_rel_pos_bias(N, N + 1, params["rel_pos_emb"])
    cos, sin, rot = rotary_tables(N, dim_head)
    out = x
    for p in params["layers"]:
        xn = _layernorm(out, p["g_attn"])
        q = jnp.einsum("bnd,hde->bhne", xn, p["wq"])
        k = jnp.einsum("bnd,de->bne", xn, p["wk"])
        v = jnp.einsum("bnd,de->bne", xn, p["wv"])
        q = q * cos + jnp.einsum("bhne,ef->bhnf", q, rot) * sin
        k = k * cos + jnp.einsum("bne,ef->bnf", k, rot) * sin
        nk = jnp.broadcast_to(p["null_k"][None], (B, 1, dim_head))
        nv = jnp.broadcast_to(p["null_v"][None], (B, 1, dim_head))
        k = jnp.concatenate([nk, k], axis=1)
        v = jnp.concatenate([nv, v], axis=1)
        q = _l2norm(q) * math.sqrt(scale)
        k = _l2norm(k) * math.sqrt(scale)
        sim = jnp.einsum("bhid,bjd->bhij", q, k) + bias_full[None]
        i_idx = jnp.arange(N)[:, None]
        j_idx = jnp.arange(N + 1)[None, :]
        causal = j_idx >= i_idx + 2
        sim = jnp.where(causal[None, None], MAX_NEG, sim)
        attn = jax.nn.softmax(sim, axis=-1)
        o = jnp.einsum("bhij,bjd->bhid", attn, v)
        o = jnp.transpose(o, (0, 2, 1, 3)).reshape(B, N, H * dim_head)
        o = o @ p["w_out"].reshape(H * dim_head, D)
        o = _layernorm(o, p["g_out"])
        out = out + o
        xn2 = _layernorm(out, p["g_ff"])
        a = xn2 @ p["wff_a"]
        g = xn2 @ p["wff_g"]
        out = out + (a * (g * jax.nn.sigmoid(g))) @ p["wff2"]
    out = _layernorm(out, params["g_norm"], stable=True)
    return out @ params["w_proj"]


if __name__ == "__main__":
    B, N, DIM = 2, 8, 32
    DEPTH, HEADS, DIM_HEAD, FF_MULT = 2, 4, 64, 4

    params = init_all_params(0, dim=DIM, depth=DEPTH, heads=HEADS,
                             dim_head=DIM_HEAD, ff_mult=FF_MULT)
    x = jax.random.normal(jax.random.PRNGKey(0), (B, N, DIM), dtype=jnp.float32)

    # Reference first (the kernel call aliases/donates the activation buffer).
    ref = jax.block_until_ready(
        reference_forward(x, params, heads=HEADS, dim_head=DIM_HEAD))

    run = jax.jit(functools.partial(flagged_causal_transformer,
                                    heads=HEADS, dim_head=DIM_HEAD))
    out = jax.block_until_ready(run(x, params))

    # bf16 matmul operands (f32 accumulation) => compare at ~1e-2 level.
    np.testing.assert_allclose(np.asarray(out), np.asarray(ref), rtol=2e-2, atol=2e-2)

    print("KERNEL_OK")
</pallas_src>

<mosaic_0001>
module attributes {stable_mosaic.version = 11 : i64} {
  func.func @fused_transformer_kernel(%arg0: i32, %arg1: i32, %arg2: memref<1x8x32xf32, #tpu.memory_space<vmem>>, %arg3: memref<4x8x1xf32, #tpu.memory_space<vmem>>, %arg4: memref<4x8x8xf32, #tpu.memory_space<vmem>>, %arg5: memref<8x64xf32, #tpu.memory_space<vmem>>, %arg6: memref<8x64xf32, #tpu.memory_space<vmem>>, %arg7: memref<1x1x32xf32, #tpu.memory_space<vmem>>, %arg8: memref<1x4x32x64xbf16, #tpu.memory_space<vmem>>, %arg9: memref<1x32x64xbf16, #tpu.memory_space<vmem>>, %arg10: memref<1x32x64xbf16, #tpu.memory_space<vmem>>, %arg11: memref<1x1x64xf32, #tpu.memory_space<vmem>>, %arg12: memref<1x1x64xf32, #tpu.memory_space<vmem>>, %arg13: memref<1x4x64x32xbf16, #tpu.memory_space<vmem>>, %arg14: memref<1x1x32xf32, #tpu.memory_space<vmem>>, %arg15: memref<1x1x32xf32, #tpu.memory_space<vmem>>, %arg16: memref<1x32x128xbf16, #tpu.memory_space<vmem>>, %arg17: memref<1x32x128xbf16, #tpu.memory_space<vmem>>, %arg18: memref<1x128x32xbf16, #tpu.memory_space<vmem>>, %arg19: memref<1x32xf32, #tpu.memory_space<vmem>>, %arg20: memref<32x32xbf16, #tpu.memory_space<vmem>>, %arg21: memref<1x8x32xf32, #tpu.memory_space<vmem>>) attributes {dimension_semantics = [#tpu.dimension_semantics<parallel>, #tpu.dimension_semantics<arbitrary>], iteration_bounds = array<i64: 2, 2>, scalar_prefetch = 0 : i64, scratch_operands = 0 : i64, tpu.core_type = #tpu.core_type<tc>, window_params = [{transform_indices = @transform_0, window_bounds = array<i64: 1, 8, 32>}, {pipeline_mode = #tpu.pipeline_mode<synchronous>, transform_indices = @transform_1, window_bounds = array<i64: 4, 8, 1>}, {pipeline_mode = #tpu.pipeline_mode<synchronous>, transform_indices = @transform_2, window_bounds = array<i64: 4, 8, 8>}, {pipeline_mode = #tpu.pipeline_mode<synchronous>, transform_indices = @transform_3, window_bounds = array<i64: 8, 64>}, {pipeline_mode = #tpu.pipeline_mode<synchronous>, transform_indices = @transform_4, window_bounds = array<i64: 8, 64>}, {transform_indices = @transform_5, window_bounds = array<i64: 1, 1, 32>}, {transform_indices = @transform_6, window_bounds = array<i64: 1, 4, 32, 64>}, {transform_indices = @transform_7, window_bounds = array<i64: 1, 32, 64>}, {transform_indices = @transform_8, window_bounds = array<i64: 1, 32, 64>}, {transform_indices = @transform_9, window_bounds = array<i64: 1, 1, 64>}, {transform_indices = @transform_10, window_bounds = array<i64: 1, 1, 64>}, {transform_indices = @transform_11, window_bounds = array<i64: 1, 4, 64, 32>}, {transform_indices = @transform_12, window_bounds = array<i64: 1, 1, 32>}, {transform_indices = @transform_13, window_bounds = array<i64: 1, 1, 32>}, {transform_indices = @transform_14, window_bounds = array<i64: 1, 32, 128>}, {transform_indices = @transform_15, window_bounds = array<i64: 1, 32, 128>}, {transform_indices = @transform_16, window_bounds = array<i64: 1, 128, 32>}, {pipeline_mode = #tpu.pipeline_mode<synchronous>, transform_indices = @transform_17, window_bounds = array<i64: 1, 32>}, {pipeline_mode = #tpu.pipeline_mode<synchronous>, transform_indices = @transform_18, window_bounds = array<i64: 32, 32>}, {transform_indices = @transform_19, window_bounds = array<i64: 1, 8, 32>}]} {
    %c0_i32 = arith.constant 0 : i32
    %0 = arith.cmpi eq, %arg1, %c0_i32 : i32
    %1 = arith.extui %0 : i1 to i32
    %c0_i32_0 = arith.constant 0 : i32
    %2 = arith.cmpi ne, %1, %c0_i32_0 : i32
    scf.if %2 {
      %c0_93 = arith.constant 0 : index
      %c0_94 = arith.constant 0 : index
      %c0_95 = arith.constant 0 : index
      %203 = vector.load %arg2[%c0_93, %c0_94, %c0_95] : memref<1x8x32xf32, #tpu.memory_space<vmem>>, vector<1x8x32xf32>
      %c0_96 = arith.constant 0 : index
      %c0_97 = arith.constant 0 : index
      %c0_98 = arith.constant 0 : index
      %204 = vector.load %arg21[%c0_96, %c0_97, %c0_98] : memref<1x8x32xf32, #tpu.memory_space<vmem>>, vector<1x8x32xf32>
      tpu.vector_store %arg21[%c0_96, %c0_97, %c0_98], %203 {strides = array<i32>} : memref<1x8x32xf32, #tpu.memory_space<vmem>>, vector<1x8x32xf32>,
    } else {
    }
    %c0 = arith.constant 0 : index
    %c0_1 = arith.constant 0 : index
    %c0_2 = arith.constant 0 : index
    %3 = vector.load %arg21[%c0, %c0_1, %c0_2] : memref<1x8x32xf32, #tpu.memory_space<vmem>>, vector<1x8x32xf32>
    %4 = vector.shape_cast %3 : vector<1x8x32xf32> to vector<8x32xf32>
    %c0_3 = arith.constant 0 : index
    %c0_4 = arith.constant 0 : index
    %5 = vector.load %arg5[%c0_3, %c0_4] : memref<8x64xf32, #tpu.memory_space<vmem>>, vector<8x64xf32>
    %c0_5 = arith.constant 0 : index
    %c0_6 = arith.constant 0 : index
    %6 = vector.load %arg6[%c0_5, %c0_6] : memref<8x64xf32, #tpu.memory_space<vmem>>, vector<8x64xf32>
    %c0_7 = arith.constant 0 : index
    %c0_8 = arith.constant 0 : index
    %c0_9 = arith.constant 0 : index
    %7 = vector.load %arg7[%c0_7, %c0_8, %c0_9] : memref<1x1x32xf32, #tpu.memory_space<vmem>>, vector<1x1x32xf32>
    %8 = vector.shape_cast %7 : vector<1x1x32xf32> to vector<1x32xf32>
    %cst = arith.constant dense<0.000000e+00> : vector<8xf32>
    %9 = vector.multi_reduction <add>, %4, %cst [1] : vector<8x32xf32> to vector<8xf32>
    %10 = vector.shape_cast %9 : vector<8xf32> to vector<8x1xf32>
    %cst_10 = arith.constant 3.200000e+01 : f32
    %11 = vector.broadcast %cst_10 : f32 to vector<8x1xf32>
    %12 = arith.divf %10, %11 : vector<8x1xf32>
    %13 = vector.broadcast %12 : vector<8x1xf32> to vector<8x32xf32>
    %14 = arith.subf %4, %13 : vector<8x32xf32>
    %15 = arith.mulf %14, %14 : vector<8x32xf32>
    %cst_11 = arith.constant dense<0.000000e+00> : vector<8xf32>
    %16 = vector.multi_reduction <add>, %15, %cst_11 [1] : vector<8x32xf32> to vector<8xf32>
    %17 = vector.shape_cast %16 : vector<8xf32> to vector<8x1xf32>
    %cst_12 = arith.constant 3.200000e+01 : f32
    %18 = vector.broadcast %cst_12 : f32 to vector<8x1xf32>
    %19 = arith.divf %17, %18 : vector<8x1xf32>
    %20 = vector.broadcast %12 : vector<8x1xf32> to vector<8x32xf32>
    %21 = arith.subf %4, %20 : vector<8x32xf32>
    %cst_13 = arith.constant 9.99999974E-6 : f32
    %22 = vector.broadcast %cst_13 : f32 to vector<8x1xf32>
    %23 = arith.addf %19, %22 : vector<8x1xf32>
    %24 = math.rsqrt %23 : vector<8x1xf32>
    %25 = vector.broadcast %24 : vector<8x1xf32> to vector<8x32xf32>
    %26 = arith.mulf %21, %25 : vector<8x32xf32>
    %27 = vector.broadcast %8 : vector<1x32xf32> to vector<8x32xf32>
    %28 = arith.mulf %26, %27 : vector<8x32xf32>
    %29 = arith.truncf %28 : vector<8x32xf32> to vector<8x32xbf16>
    %30 = vector.shape_cast %29 : vector<8x32xbf16> to vector<1x8x32xbf16>
    %31 = vector.shape_cast %30 : vector<1x8x32xbf16> to vector<1x8x32xbf16>
    %32 = vector.broadcast %31 : vector<1x8x32xbf16> to vector<4x8x32xbf16>
    %c0_14 = arith.constant 0 : index
    %c0_15 = arith.constant 0 : index
    %c0_16 = arith.constant 0 : index
    %c0_17 = arith.constant 0 : index
    %33 = vector.load %arg8[%c0_14, %c0_15, %c0_16, %c0_17] : memref<1x4x32x64xbf16, #tpu.memory_space<vmem>>, vector<1x4x32x64xbf16>
    %34 = vector.shape_cast %33 : vector<1x4x32x64xbf16> to vector<4x32x64xbf16>
    "tpu.trace_start"() <{level = 10 : i32, message = "hnd,hde->hne"}> : () -> ()
    %cst_18 = arith.constant dense<0.000000e+00> : vector<4x8x64xf32>
    %35 = tpu.matmul %32, %34, %cst_18 {dimension_numbers = #tpu.dot_dimension_numbers<[2], [1], [1], [2], [0, 0, 0, 1, 1, 2], [0], [0]>} : vector<4x8x32xbf16>, vector<4x32x64xbf16>, vector<4x8x64xf32> -> vector<4x8x64xf32>
    "tpu.trace_stop"() : () -> ()
    %c0_19 = arith.constant 0 : index
    %c0_20 = arith.constant 0 : index
    %c0_21 = arith.constant 0 : index
    %36 = vector.load %arg9[%c0_19, %c0_20, %c0_21] : memref<1x32x64xbf16, #tpu.memory_space<vmem>>, vector<1x32x64xbf16>
    %37 = vector.shape_cast %36 : vector<1x32x64xbf16> to vector<32x64xbf16>
    %cst_22 = arith.constant dense<0.000000e+00> : vector<8x64xf32>
    %38 = tpu.matmul %29, %37, %cst_22 {dimension_numbers = #tpu.dot_dimension_numbers<[1], [0], [0], [1], [0, 0, 1, 1], [], []>} : vector<8x32xbf16>, vector<32x64xbf16>, vector<8x64xf32> -> vector<8x64xf32>
    %c0_23 = arith.constant 0 : index
    %c0_24 = arith.constant 0 : index
    %c0_25 = arith.constant 0 : index
    %39 = vector.load %arg10[%c0_23, %c0_24, %c0_25] : memref<1x32x64xbf16, #tpu.memory_space<vmem>>, vector<1x32x64xbf16>
    %40 = vector.shape_cast %39 : vector<1x32x64xbf16> to vector<32x64xbf16>
    %cst_26 = arith.constant dense<0.000000e+00> : vector<8x64xf32>
    %41 = tpu.matmul %29, %40, %cst_26 {dimension_numbers = #tpu.dot_dimension_numbers<[1], [0], [0], [1], [0, 0, 1, 1], [], []>} : vector<8x32xbf16>, vector<32x64xbf16>, vector<8x64xf32> -> vector<8x64xf32>
    %42 = vector.shape_cast %5 : vector<8x64xf32> to vector<1x8x64xf32>
    %43 = vector.broadcast %42 : vector<1x8x64xf32> to vector<4x8x64xf32>
    %44 = arith.mulf %35, %43 : vector<4x8x64xf32>
    %c32_i32 = arith.constant 32 : i32
    %45 = tpu.dynamic_rotate %35 by %c32_i32 dim 2 : vector<4x8x64xf32>, i32 -> vector<4x8x64xf32>
    %46 = vector.shape_cast %6 : vector<8x64xf32> to vector<1x8x64xf32>
    %47 = vector.broadcast %46 : vector<1x8x64xf32> to vector<4x8x64xf32>
    %48 = arith.mulf %45, %47 : vector<4x8x64xf32>
    %49 = arith.addf %44, %48 : vector<4x8x64xf32>
    %50 = arith.mulf %38, %5 : vector<8x64xf32>
    %c32_i32_27 = arith.constant 32 : i32
    %51 = tpu.dynamic_rotate %38 by %c32_i32_27 dim 1 : vector<8x64xf32>, i32 -> vector<8x64xf32>
    %52 = arith.mulf %51, %6 : vector<8x64xf32>
    %53 = arith.addf %50, %52 : vector<8x64xf32>
    %54 = arith.mulf %49, %49 : vector<4x8x64xf32>
    %cst_28 = arith.constant dense<0.000000e+00> : vector<4x8xf32>
    %55 = vector.multi_reduction <add>, %54, %cst_28 [2] : vector<4x8x64xf32> to vector<4x8xf32>
    %56 = vector.shape_cast %55 : vector<4x8xf32> to vector<4x8x1xf32>
    %57 = math.sqrt %56 : vector<4x8x1xf32>
    %cst_29 = arith.constant 9.99999996E-13 : f32
    %58 = vector.broadcast %cst_29 : f32 to vector<4x8x1xf32>
    %59 = arith.maximumf %57, %58 : vector<4x8x1xf32>
    %60 = vector.broadcast %59 : vector<4x8x1xf32> to vector<4x8x64xf32>
    %61 = arith.divf %49, %60 : vector<4x8x64xf32>
    %cst_30 = arith.constant 4.000000e+00 : f32
    %62 = vector.broadcast %cst_30 : f32 to vector<4x8x64xf32>
    %63 = arith.mulf %61, %62 : vector<4x8x64xf32>
    %64 = arith.mulf %53, %53 : vector<8x64xf32>
    %cst_31 = arith.constant dense<0.000000e+00> : vector<8xf32>
    %65 = vector.multi_reduction <add>, %64, %cst_31 [1] : vector<8x64xf32> to vector<8xf32>
    %66 = vector.shape_cast %65 : vector<8xf32> to vector<8x1xf32>
    %67 = math.sqrt %66 : vector<8x1xf32>
    %cst_32 = arith.constant 9.99999996E-13 : f32
    %68 = vector.broadcast %cst_32 : f32 to vector<8x1xf32>
    %69 = arith.maximumf %67, %68 : vector<8x1xf32>
    %70 = vector.broadcast %69 : vector<8x1xf32> to vector<8x64xf32>
    %71 = arith.divf %53, %70 : vector<8x64xf32>
    %cst_33 = arith.constant 4.000000e+00 : f32
    %72 = vector.broadcast %cst_33 : f32 to vector<8x64xf32>
    %73 = arith.mulf %71, %72 : vector<8x64xf32>
    %c0_34 = arith.constant 0 : index
    %c0_35 = arith.constant 0 : index
    %c0_36 = arith.constant 0 : index
    %74 = vector.load %arg11[%c0_34, %c0_35, %c0_36] : memref<1x1x64xf32, #tpu.memory_space<vmem>>, vector<1x1x64xf32>
    %75 = vector.shape_cast %74 : vector<1x1x64xf32> to vector<1x64xf32>
    %76 = arith.mulf %75, %75 : vector<1x64xf32>
    %cst_37 = arith.constant dense<0.000000e+00> : vector<1xf32>
    %77 = vector.multi_reduction <add>, %76, %cst_37 [1] : vector<1x64xf32> to vector<1xf32>
    %78 = vector.shape_cast %77 : vector<1xf32> to vector<1x1xf32>
    %79 = math.sqrt %78 : vector<1x1xf32>
    %cst_38 = arith.constant 9.99999996E-13 : f32
    %80 = vector.broadcast %cst_38 : f32 to vector<1x1xf32>
    %81 = arith.maximumf %79, %80 : vector<1x1xf32>
    %82 = vector.broadcast %81 : vector<1x1xf32> to vector<1x64xf32>
    %83 = arith.divf %75, %82 : vector<1x64xf32>
    %cst_39 = arith.constant 4.000000e+00 : f32
    %84 = vector.broadcast %cst_39 : f32 to vector<1x64xf32>
    %85 = arith.mulf %83, %84 : vector<1x64xf32>
    %c0_40 = arith.constant 0 : index
    %c0_41 = arith.constant 0 : index
    %c0_42 = arith.constant 0 : index
    %86 = vector.load %arg12[%c0_40, %c0_41, %c0_42] : memref<1x1x64xf32, #tpu.memory_space<vmem>>, vector<1x1x64xf32>
    %87 = vector.shape_cast %86 : vector<1x1x64xf32> to vector<1x64xf32>
    %88 = arith.truncf %73 : vector<8x64xf32> to vector<8x64xbf16>
    %89 = vector.shape_cast %88 : vector<8x64xbf16> to vector<1x8x64xbf16>
    %90 = vector.shape_cast %89 : vector<1x8x64xbf16> to vector<1x8x64xbf16>
    %91 = vector.broadcast %90 : vector<1x8x64xbf16> to vector<4x8x64xbf16>
    %92 = arith.truncf %63 : vector<4x8x64xf32> to vector<4x8x64xbf16>
    "tpu.trace_start"() <{level = 10 : i32, message = "hqd,hkd->hqk"}> : () -> ()
    %cst_43 = arith.constant dense<0.000000e+00> : vector<4x8x8xf32>
    %93 = tpu.matmul %92, %91, %cst_43 {dimension_numbers = #tpu.dot_dimension_numbers<[2], [2], [1], [1], [0, 0, 0, 1, 1, 1], [0], [0]>} : vector<4x8x64xbf16>, vector<4x8x64xbf16>, vector<4x8x8xf32> -> vector<4x8x8xf32>
    "tpu.trace_stop"() : () -> ()
    %c0_44 = arith.constant 0 : index
    %c0_45 = arith.constant 0 : index
    %c0_46 = arith.constant 0 : index
    %94 = vector.load %arg4[%c0_44, %c0_45, %c0_46] : memref<4x8x8xf32, #tpu.memory_space<vmem>>, vector<4x8x8xf32>
    %95 = arith.addf %93, %94 : vector<4x8x8xf32>
    %96 = vector.shape_cast %85 : vector<1x64xf32> to vector<1x1x64xf32>
    %97 = vector.broadcast %96 : vector<1x1x64xf32> to vector<4x8x64xf32>
    %98 = arith.mulf %63, %97 : vector<4x8x64xf32>
    %cst_47 = arith.constant dense<0.000000e+00> : vector<4x8xf32>
    %99 = vector.multi_reduction <add>, %98, %cst_47 [2] : vector<4x8x64xf32> to vector<4x8xf32>
    %100 = vector.shape_cast %99 : vector<4x8xf32> to vector<4x8x1xf32>
    %c0_48 = arith.constant 0 : index
    %c0_49 = arith.constant 0 : index
    %c0_50 = arith.constant 0 : index
    %101 = vector.load %arg3[%c0_48, %c0_49, %c0_50] : memref<4x8x1xf32, #tpu.memory_space<vmem>>, vector<4x8x1xf32>
    %102 = arith.addf %100, %101 : vector<4x8x1xf32>
    %cst_51 = arith.constant dense<0xFF800000> : vector<4x8xf32>
    %103 = vector.multi_reduction <maximumf>, %95, %cst_51 [2] : vector<4x8x8xf32> to vector<4x8xf32>
    %104 = vector.shape_cast %103 : vector<4x8xf32> to vector<4x8x1xf32>
    %105 = arith.maximumf %104, %102 : vector<4x8x1xf32>
    %106 = vector.broadcast %105 : vector<4x8x1xf32> to vector<4x8x8xf32>
    %107 = arith.subf %95, %106 : vector<4x8x8xf32>
    %108 = math.exp %107 : vector<4x8x8xf32>
    %109 = arith.subf %102, %105 : vector<4x8x1xf32>
    %110 = math.exp %109 : vector<4x8x1xf32>
    %cst_52 = arith.constant dense<0.000000e+00> : vector<4x8xf32>
    %111 = vector.multi_reduction <add>, %108, %cst_52 [2] : vector<4x8x8xf32> to vector<4x8xf32>
    %112 = vector.shape_cast %111 : vector<4x8xf32> to vector<4x8x1xf32>
    %113 = arith.addf %112, %110 : vector<4x8x1xf32>
    %114 = arith.truncf %41 : vector<8x64xf32> to vector<8x64xbf16>
    %115 = vector.shape_cast %114 : vector<8x64xbf16> to vector<1x8x64xbf16>
    %116 = vector.shape_cast %115 : vector<1x8x64xbf16> to vector<1x8x64xbf16>
    %117 = vector.broadcast %116 : vector<1x8x64xbf16> to vector<4x8x64xbf16>
    %118 = arith.truncf %108 : vector<4x8x8xf32> to vector<4x8x8xbf16>
    "tpu.trace_start"() <{level = 10 : i32, message = "hqk,hkd->hqd"}> : () -> ()
    %cst_53 = arith.constant dense<0.000000e+00> : vector<4x8x64xf32>
    %119 = tpu.matmul %118, %117, %cst_53 {dimension_numbers = #tpu.dot_dimension_numbers<[2], [1], [1], [2], [0, 0, 0, 1, 1, 2], [0], [0]>} : vector<4x8x8xbf16>, vector<4x8x64xbf16>, vector<4x8x64xf32> -> vector<4x8x64xf32>
    "tpu.trace_stop"() : () -> ()
    %120 = vector.shape_cast %87 : vector<1x64xf32> to vector<1x1x64xf32>
    %121 = vector.broadcast %110 : vector<4x8x1xf32> to vector<4x8x64xf32>
    %122 = vector.broadcast %120 : vector<1x1x64xf32> to vector<4x8x64xf32>
    %123 = arith.mulf %121, %122 : vector<4x8x64xf32>
    %124 = arith.addf %119, %123 : vector<4x8x64xf32>
    %125 = tpu.reciprocal %113 {approx = true} : vector<4x8x1xf32> -> vector<4x8x1xf32>
    %126 = vector.broadcast %125 : vector<4x8x1xf32> to vector<4x8x64xf32>
    %127 = arith.mulf %124, %126 : vector<4x8x64xf32>
    %128 = arith.truncf %127 : vector<4x8x64xf32> to vector<4x8x64xbf16>
    %c0_54 = arith.constant 0 : index
    %c0_55 = arith.constant 0 : index
    %c0_56 = arith.constant 0 : index
    %c0_57 = arith.constant 0 : index
    %129 = vector.load %arg13[%c0_54, %c0_55, %c0_56, %c0_57] : memref<1x4x64x32xbf16, #tpu.memory_space<vmem>>, vector<1x4x64x32xbf16>
    %130 = vector.shape_cast %129 : vector<1x4x64x32xbf16> to vector<4x64x32xbf16>
    "tpu.trace_start"() <{level = 10 : i32, message = "hqd,hde->hqe"}> : () -> ()
    %cst_58 = arith.constant dense<0.000000e+00> : vector<4x8x32xf32>
    %131 = tpu.matmul %128, %130, %cst_58 {dimension_numbers = #tpu.dot_dimension_numbers<[2], [1], [1], [2], [0, 0, 0, 1, 1, 2], [0], [0]>} : vector<4x8x64xbf16>, vector<4x64x32xbf16>, vector<4x8x32xf32> -> vector<4x8x32xf32>
    "tpu.trace_stop"() : () -> ()
    %cst_59 = arith.constant dense<0.000000e+00> : vector<8x32xf32>
    %132 = vector.multi_reduction <add>, %131, %cst_59 [0] : vector<4x8x32xf32> to vector<8x32xf32>
    %c0_60 = arith.constant 0 : index
    %c0_61 = arith.constant 0 : index
    %c0_62 = arith.constant 0 : index
    %133 = vector.load %arg14[%c0_60, %c0_61, %c0_62] : memref<1x1x32xf32, #tpu.memory_space<vmem>>, vector<1x1x32xf32>
    %134 = vector.shape_cast %133 : vector<1x1x32xf32> to vector<1x32xf32>
    %cst_63 = arith.constant dense<0.000000e+00> : vector<8xf32>
    %135 = vector.multi_reduction <add>, %132, %cst_63 [1] : vector<8x32xf32> to vector<8xf32>
    %136 = vector.shape_cast %135 : vector<8xf32> to vector<8x1xf32>
    %cst_64 = arith.constant 3.200000e+01 : f32
    %137 = vector.broadcast %cst_64 : f32 to vector<8x1xf32>
    %138 = arith.divf %136, %137 : vector<8x1xf32>
    %139 = vector.broadcast %138 : vector<8x1xf32> to vector<8x32xf32>
    %140 = arith.subf %132, %139 : vector<8x32xf32>
    %141 = arith.mulf %140, %140 : vector<8x32xf32>
    %cst_65 = arith.constant dense<0.000000e+00> : vector<8xf32>
    %142 = vector.multi_reduction <add>, %141, %cst_65 [1] : vector<8x32xf32> to vector<8xf32>
    %143 = vector.shape_cast %142 : vector<8xf32> to vector<8x1xf32>
    %cst_66 = arith.constant 3.200000e+01 : f32
    %144 = vector.broadcast %cst_66 : f32 to vector<8x1xf32>
    %145 = arith.divf %143, %144 : vector<8x1xf32>
    %146 = vector.broadcast %138 : vector<8x1xf32> to vector<8x32xf32>
    %147 = arith.subf %132, %146 : vector<8x32xf32>
    %cst_67 = arith.constant 9.99999974E-6 : f32
    %148 = vector.broadcast %cst_67 : f32 to vector<8x1xf32>
    %149 = arith.addf %145, %148 : vector<8x1xf32>
    %150 = math.rsqrt %149 : vector<8x1xf32>
    %151 = vector.broadcast %150 : vector<8x1xf32> to vector<8x32xf32>
    %152 = arith.mulf %147, %151 : vector<8x32xf32>
    %153 = vector.broadcast %134 : vector<1x32xf32> to vector<8x32xf32>
    %154 = arith.mulf %152, %153 : vector<8x32xf32>
    %155 = arith.addf %4, %154 : vector<8x32xf32>
    %c0_68 = arith.constant 0 : index
    %c0_69 = arith.constant 0 : index
    %c0_70 = arith.constant 0 : index
    %156 = vector.load %arg15[%c0_68, %c0_69, %c0_70] : memref<1x1x32xf32, #tpu.memory_space<vmem>>, vector<1x1x32xf32>
    %157 = vector.shape_cast %156 : vector<1x1x32xf32> to vector<1x32xf32>
    %cst_71 = arith.constant dense<0.000000e+00> : vector<8xf32>
    %158 = vector.multi_reduction <add>, %155, %cst_71 [1] : vector<8x32xf32> to vector<8xf32>
    %159 = vector.shape_cast %158 : vector<8xf32> to vector<8x1xf32>
    %cst_72 = arith.constant 3.200000e+01 : f32
    %160 = vector.broadcast %cst_72 : f32 to vector<8x1xf32>
    %161 = arith.divf %159, %160 : vector<8x1xf32>
    %162 = vector.broadcast %161 : vector<8x1xf32> to vector<8x32xf32>
    %163 = arith.subf %155, %162 : vector<8x32xf32>
    %164 = arith.mulf %163, %163 : vector<8x32xf32>
    %cst_73 = arith.constant dense<0.000000e+00> : vector<8xf32>
    %165 = vector.multi_reduction <add>, %164, %cst_73 [1] : vector<8x32xf32> to vector<8xf32>
    %166 = vector.shape_cast %165 : vector<8xf32> to vector<8x1xf32>
    %cst_74 = arith.constant 3.200000e+01 : f32
    %167 = vector.broadcast %cst_74 : f32 to vector<8x1xf32>
    %168 = arith.divf %166, %167 : vector<8x1xf32>
    %169 = vector.broadcast %161 : vector<8x1xf32> to vector<8x32xf32>
    %170 = arith.subf %155, %169 : vector<8x32xf32>
    %cst_75 = arith.constant 9.99999974E-6 : f32
    %171 = vector.broadcast %cst_75 : f32 to vector<8x1xf32>
    %172 = arith.addf %168, %171 : vector<8x1xf32>
    %173 = math.rsqrt %172 : vector<8x1xf32>
    %174 = vector.broadcast %173 : vector<8x1xf32> to vector<8x32xf32>
    %175 = arith.mulf %170, %174 : vector<8x32xf32>
    %176 = vector.broadcast %157 : vector<1x32xf32> to vector<8x32xf32>
    %177 = arith.mulf %175, %176 : vector<8x32xf32>
    %178 = arith.truncf %177 : vector<8x32xf32> to vector<8x32xbf16>
    %c0_76 = arith.constant 0 : index
    %c0_77 = arith.constant 0 : index
    %c0_78 = arith.constant 0 : index
    %179 = vector.load %arg16[%c0_76, %c0_77, %c0_78] : memref<1x32x128xbf16, #tpu.memory_space<vmem>>, vector<1x32x128xbf16>
    %180 = vector.shape_cast %179 : vector<1x32x128xbf16> to vector<32x128xbf16>
    %cst_79 = arith.constant dense<0.000000e+00> : vector<8x128xf32>
    %181 = tpu.matmul %178, %180, %cst_79 {dimension_numbers = #tpu.dot_dimension_numbers<[1], [0], [0], [1], [0, 0, 1, 1], [], []>} : vector<8x32xbf16>, vector<32x128xbf16>, vector<8x128xf32> -> vector<8x128xf32>
    %c0_80 = arith.constant 0 : index
    %c0_81 = arith.constant 0 : index
    %c0_82 = arith.constant 0 : index
    %182 = vector.load %arg17[%c0_80, %c0_81, %c0_82] : memref<1x32x128xbf16, #tpu.memory_space<vmem>>, vector<1x32x128xbf16>
    %183 = vector.shape_cast %182 : vector<1x32x128xbf16> to vector<32x128xbf16>
    %cst_83 = arith.constant dense<0.000000e+00> : vector<8x128xf32>
    %184 = tpu.matmul %178, %183, %cst_83 {dimension_numbers = #tpu.dot_dimension_numbers<[1], [0], [0], [1], [0, 0, 1, 1], [], []>} : vector<8x32xbf16>, vector<32x128xbf16>, vector<8x128xf32> -> vector<8x128xf32>
    %185 = arith.negf %184 : vector<8x128xf32>
    %186 = math.exp %185 : vector<8x128xf32>
    %cst_84 = arith.constant 1.000000e+00 : f32
    %187 = vector.broadcast %cst_84 : f32 to vector<8x128xf32>
    %188 = arith.addf %187, %186 : vector<8x128xf32>
    %189 = arith.divf %187, %188 : vector<8x128xf32>
    %190 = arith.mulf %184, %189 : vector<8x128xf32>
    %191 = arith.mulf %181, %190 : vector<8x128xf32>
    %192 = arith.truncf %191 : vector<8x128xf32> to vector<8x128xbf16>
    %c0_85 = arith.constant 0 : index
    %c0_86 = arith.constant 0 : index
    %c0_87 = arith.constant 0 : index
    %193 = vector.load %arg18[%c0_85, %c0_86, %c0_87] : memref<1x128x32xbf16, #tpu.memory_space<vmem>>, vector<1x128x32xbf16>
    %194 = vector.shape_cast %193 : vector<1x128x32xbf16> to vector<128x32xbf16>
    %cst_88 = arith.constant dense<0.000000e+00> : vector<8x32xf32>
    %195 = tpu.matmul %192, %194, %cst_88 {dimension_numbers = #tpu.dot_dimension_numbers<[1], [0], [0], [1], [0, 0, 1, 1], [], []>} : vector<8x128xbf16>, vector<128x32xbf16>, vector<8x32xf32> -> vector<8x32xf32>
    %196 = arith.addf %155, %195 : vector<8x32xf32>
    %c0_89 = arith.constant 0 : index
    %c0_90 = arith.constant 0 : index
    %c0_91 = arith.constant 0 : index
    %197 = vector.load %arg21[%c0_89, %c0_90, %c0_91] : memref<1x8x32xf32, #tpu.memory_space<vmem>>, vector<1x8x32xf32>
    %198 = vector.shape_cast %197 : vector<1x8x32xf32> to vector<8x32xf32>
    %199 = vector.shape_cast %196 : vector<8x32xf32> to vector<1x8x32xf32>
    tpu.vector_store %arg21[%c0_89, %c0_90, %c0_91], %199 {strides = array<i32>} : memref<1x8x32xf32, #tpu.memory_space<vmem>>, vector<1x8x32xf32>,
    %c1_i32 = arith.constant 1 : i32
    %200 = arith.cmpi eq, %arg1, %c1_i32 : i32
    %201 = arith.extui %200 : i1 to i32
    %c0_i32_92 = arith.constant 0 : i32
    %202 = arith.cmpi ne, %201, %c0_i32_92 : i32
    scf.if %202 {
      %c0_93 = arith.constant 0 : index
      %c0_94 = arith.constant 0 : index
      %203 = vector.load %arg19[%c0_93, %c0_94] : memref<1x32xf32, #tpu.memory_space<vmem>>, vector<1x32xf32>
      %cst_95 = arith.constant dense<0xFF800000> : vector<8xf32>
      %204 = vector.multi_reduction <maximumf>, %196, %cst_95 [1] : vector<8x32xf32> to vector<8xf32>
      %205 = vector.shape_cast %204 : vector<8xf32> to vector<8x1xf32>
      %206 = vector.broadcast %205 : vector<8x1xf32> to vector<8x32xf32>
      %207 = arith.divf %196, %206 : vector<8x32xf32>
      %cst_96 = arith.constant dense<0.000000e+00> : vector<8xf32>
      %208 = vector.multi_reduction <add>, %207, %cst_96 [1] : vector<8x32xf32> to vector<8xf32>
      %209 = vector.shape_cast %208 : vector<8xf32> to vector<8x1xf32>
      %cst_97 = arith.constant 3.200000e+01 : f32
      %210 = vector.broadcast %cst_97 : f32 to vector<8x1xf32>
      %211 = arith.divf %209, %210 : vector<8x1xf32>
      %212 = vector.broadcast %211 : vector<8x1xf32> to vector<8x32xf32>
      %213 = arith.subf %207, %212 : vector<8x32xf32>
      %214 = arith.mulf %213, %213 : vector<8x32xf32>
      %cst_98 = arith.constant dense<0.000000e+00> : vector<8xf32>
      %215 = vector.multi_reduction <add>, %214, %cst_98 [1] : vector<8x32xf32> to vector<8xf32>
      %216 = vector.shape_cast %215 : vector<8xf32> to vector<8x1xf32>
      %cst_99 = arith.constant 3.200000e+01 : f32
      %217 = vector.broadcast %cst_99 : f32 to vector<8x1xf32>
      %218 = arith.divf %216, %217 : vector<8x1xf32>
      %219 = vector.broadcast %211 : vector<8x1xf32> to vector<8x32xf32>
      %220 = arith.subf %207, %219 : vector<8x32xf32>
      %cst_100 = arith.constant 9.99999974E-6 : f32
      %221 = vector.broadcast %cst_100 : f32 to vector<8x1xf32>
      %222 = arith.addf %218, %221 : vector<8x1xf32>
      %223 = math.rsqrt %222 : vector<8x1xf32>
      %224 = vector.broadcast %223 : vector<8x1xf32> to vector<8x32xf32>
      %225 = arith.mulf %220, %224 : vector<8x32xf32>
      %226 = vector.broadcast %203 : vector<1x32xf32> to vector<8x32xf32>
      %227 = arith.mulf %225, %226 : vector<8x32xf32>
      %228 = arith.truncf %227 : vector<8x32xf32> to vector<8x32xbf16>
      %c0_101 = arith.constant 0 : index
      %c0_102 = arith.constant 0 : index
      %229 = vector.load %arg20[%c0_101, %c0_102] : memref<32x32xbf16, #tpu.memory_space<vmem>>, vector<32x32xbf16>
      %cst_103 = arith.constant dense<0.000000e+00> : vector<8x32xf32>
      %230 = tpu.matmul %228, %229, %cst_103 {dimension_numbers = #tpu.dot_dimension_numbers<[1], [0], [0], [1], [0, 0, 1, 1], [], []>} : vector<8x32xbf16>, vector<32x32xbf16>, vector<8x32xf32> -> vector<8x32xf32>
      %c0_104 = arith.constant 0 : index
      %c0_105 = arith.constant 0 : index
      %c0_106 = arith.constant 0 : index
      %231 = vector.load %arg21[%c0_104, %c0_105, %c0_106] : memref<1x8x32xf32, #tpu.memory_space<vmem>>, vector<1x8x32xf32>
      %232 = vector.shape_cast %231 : vector<1x8x32xf32> to vector<8x32xf32>
      %233 = vector.shape_cast %230 : vector<8x32xf32> to vector<1x8x32xf32>
      tpu.vector_store %arg21[%c0_104, %c0_105, %c0_106], %233 {strides = array<i32>} : memref<1x8x32xf32, #tpu.memory_space<vmem>>, vector<1x8x32xf32>,
    } else {
    }
    return
  }
  func.func @transform_0(%arg0: i32, %arg1: i32) -> (i32, i32, i32) {
    %c0_i32 = arith.constant 0 : i32
    %c0_i32_0 = arith.constant 0 : i32
    %c0_i32_1 = arith.constant 0 : i32
    return %arg0, %c0_i32, %c0_i32_0 : i32, i32, i32
  }
  func.func @transform_1(%arg0: i32, %arg1: i32) -> (i32, i32, i32) {
    %c0_i32 = arith.constant 0 : i32
    %c0_i32_0 = arith.constant 0 : i32
    %c0_i32_1 = arith.constant 0 : i32
    %c0_i32_2 = arith.constant 0 : i32
    return %c0_i32, %c0_i32_0, %c0_i32_1 : i32, i32, i32
  }
  func.func @transform_2(%arg0: i32, %arg1: i32) -> (i32, i32, i32) {
    %c0_i32 = arith.constant 0 : i32
    %c0_i32_0 = arith.constant 0 : i32
    %c0_i32_1 = arith.constant 0 : i32
    %c0_i32_2 = arith.constant 0 : i32
    return %c0_i32, %c0_i32_0, %c0_i32_1 : i32, i32, i32
  }
  func.func @transform_3(%arg0: i32, %arg1: i32) -> (i32, i32) {
    %c0_i32 = arith.constant 0 : i32
    %c0_i32_0 = arith.constant 0 : i32
    %c0_i32_1 = arith.constant 0 : i32
    return %c0_i32, %c0_i32_0 : i32, i32
  }
  func.func @transform_4(%arg0: i32, %arg1: i32) -> (i32, i32) {
    %c0_i32 = arith.constant 0 : i32
    %c0_i32_0 = arith.constant 0 : i32
    %c0_i32_1 = arith.constant 0 : i32
    return %c0_i32, %c0_i32_0 : i32, i32
  }
  func.func @transform_5(%arg0: i32, %arg1: i32) -> (i32, i32, i32) {
    %c0_i32 = arith.constant 0 : i32
    %c0_i32_0 = arith.constant 0 : i32
    %c0_i32_1 = arith.constant 0 : i32
    return %arg1, %c0_i32, %c0_i32_0 : i32, i32, i32
  }
  func.func @transform_6(%arg0: i32, %arg1: i32) -> (i32, i32, i32, i32) {
    %c0_i32 = arith.constant 0 : i32
    %c0_i32_0 = arith.constant 0 : i32
    %c0_i32_1 = arith.constant 0 : i32
    %c0_i32_2 = arith.constant 0 : i32
    return %arg1, %c0_i32, %c0_i32_0, %c0_i32_1 : i32, i32, i32, i32
  }
  func.func @transform_7(%arg0: i32, %arg1: i32) -> (i32, i32, i32) {
    %c0_i32 = arith.constant 0 : i32
    %c0_i32_0 = arith.constant 0 : i32
    %c0_i32_1 = arith.constant 0 : i32
    return %arg1, %c0_i32, %c0_i32_0 : i32, i32, i32
  }
  func.func @transform_8(%arg0: i32, %arg1: i32) -> (i32, i32, i32) {
    %c0_i32 = arith.constant 0 : i32
    %c0_i32_0 = arith.constant 0 : i32
    %c0_i32_1 = arith.constant 0 : i32
    return %arg1, %c0_i32, %c0_i32_0 : i32, i32, i32
  }
  func.func @transform_9(%arg0: i32, %arg1: i32) -> (i32, i32, i32) {
    %c0_i32 = arith.constant 0 : i32
    %c0_i32_0 = arith.constant 0 : i32
    %c0_i32_1 = arith.constant 0 : i32
    return %arg1, %c0_i32, %c0_i32_0 : i32, i32, i32
  }
  func.func @transform_10(%arg0: i32, %arg1: i32) -> (i32, i32, i32) {
    %c0_i32 = arith.constant 0 : i32
    %c0_i32_0 = arith.constant 0 : i32
    %c0_i32_1 = arith.constant 0 : i32
    return %arg1, %c0_i32, %c0_i32_0 : i32, i32, i32
  }
  func.func @transform_11(%arg0: i32, %arg1: i32) -> (i32, i32, i32, i32) {
    %c0_i32 = arith.constant 0 : i32
    %c0_i32_0 = arith.constant 0 : i32
    %c0_i32_1 = arith.constant 0 : i32
    %c0_i32_2 = arith.constant 0 : i32
    return %arg1, %c0_i32, %c0_i32_0, %c0_i32_1 : i32, i32, i32, i32
  }
  func.func @transform_12(%arg0: i32, %arg1: i32) -> (i32, i32, i32) {
    %c0_i32 = arith.constant 0 : i32
    %c0_i32_0 = arith.constant 0 : i32
    %c0_i32_1 = arith.constant 0 : i32
    return %arg1, %c0_i32, %c0_i32_0 : i32, i32, i32
  }
  func.func @transform_13(%arg0: i32, %arg1: i32) -> (i32, i32, i32) {
    %c0_i32 = arith.constant 0 : i32
    %c0_i32_0 = arith.constant 0 : i32
    %c0_i32_1 = arith.constant 0 : i32
    return %arg1, %c0_i32, %c0_i32_0 : i32, i32, i32
  }
  func.func @transform_14(%arg0: i32, %arg1: i32) -> (i32, i32, i32) {
    %c0_i32 = arith.constant 0 : i32
    %c0_i32_0 = arith.constant 0 : i32
    %c0_i32_1 = arith.constant 0 : i32
    return %arg1, %c0_i32, %c0_i32_0 : i32, i32, i32
  }
  func.func @transform_15(%arg0: i32, %arg1: i32) -> (i32, i32, i32) {
    %c0_i32 = arith.constant 0 : i32
    %c0_i32_0 = arith.constant 0 : i32
    %c0_i32_1 = arith.constant 0 : i32
    return %arg1, %c0_i32, %c0_i32_0 : i32, i32, i32
  }
  func.func @transform_16(%arg0: i32, %arg1: i32) -> (i32, i32, i32) {
    %c0_i32 = arith.constant 0 : i32
    %c0_i32_0 = arith.constant 0 : i32
    %c0_i32_1 = arith.constant 0 : i32
    return %arg1, %c0_i32, %c0_i32_0 : i32, i32, i32
  }
  func.func @transform_17(%arg0: i32, %arg1: i32) -> (i32, i32) {
    %c0_i32 = arith.constant 0 : i32
    %c0_i32_0 = arith.constant 0 : i32
    %c0_i32_1 = arith.constant 0 : i32
    return %c0_i32, %c0_i32_0 : i32, i32
  }
  func.func @transform_18(%arg0: i32, %arg1: i32) -> (i32, i32) {
    %c0_i32 = arith.constant 0 : i32
    %c0_i32_0 = arith.constant 0 : i32
    %c0_i32_1 = arith.constant 0 : i32
    return %c0_i32, %c0_i32_0 : i32, i32
  }
  func.func @transform_19(%arg0: i32, %arg1: i32) -> (i32, i32, i32) {
    %c0_i32 = arith.constant 0 : i32
    %c0_i32_0 = arith.constant 0 : i32
    %c0_i32_1 = arith.constant 0 : i32
    return %arg0, %c0_i32, %c0_i32_0 : i32, i32, i32
  }
}

</mosaic_0001>

<bundles_post_ra>
// kernel: flagged_causal_transformer.1
= control target key start
LH: loop header
LB: loop body
LE: loop exit
PB: predicated region body
PF: predicated region fallthrough
CT: control target
= control target key end

     0   :  { %s4245_s0 = inlined_call_operand.hbm [shape: f32[2,8,32], index: 0, kind: input, shape index: {}, may-alias: {0,19}]   ;;  %s4246_s1 = inlined_call_operand.vmem [shape: f32[4,8,1], index: 1, kind: input, shape index: {}]   ;;  %s4247_s2 = inlined_call_operand.vmem [shape: f32[4,8,8], index: 2, kind: input, shape index: {}]   ;;  %s4248_s3 = inlined_call_operand.vmem [shape: f32[8,64], index: 3, kind: input, shape index: {}]   ;;  %s4249_s4 = inlined_call_operand.vmem [shape: f32[8,64], index: 4, kind: input, shape index: {}]   ;;  %s4250_s5 = inlined_call_operand.vmem [shape: f32[2,1,32], index: 5, kind: input, shape index: {}]   ;;  %s4251_s6 = inlined_call_operand.vmem [shape: bf16[2,4,32,64], index: 6, kind: input, shape index: {}]   ;;  %s4252_s7 = inlined_call_operand.vmem [shape: bf16[2,32,64], index: 7, kind: input, shape index: {}]   ;;  %s4253_s8 = inlined_call_operand.vmem [shape: bf16[2,32,64], index: 8, kind: input, shape index: {}]   ;;  %s4254_s9 = inlined_call_operand.vmem [shape: f32[2,1,64], index: 9, kind: input, shape index: {}]   ;;  %s4255_s10 = inlined_call_operand.vmem [shape: f32[2,1,64], index: 10, kind: input, shape index: {}]   ;;  %s4256_s11 = inlined_call_operand.vmem [shape: bf16[2,4,64,32], index: 11, kind: input, shape index: {}]   ;;  %s4257_s12 = inlined_call_operand.vmem [shape: f32[2,1,32], index: 12, kind: input, shape index: {}]   ;;  %s4258_s13 = inlined_call_operand.vmem [shape: f32[2,1,32], index: 13, kind: input, shape index: {}]   ;;  %s4259_s14 = inlined_call_operand.vmem [shape: bf16[2,32,128], index: 14, kind: input, shape index: {}]   ;;  %s4260_s15 = inlined_call_operand.vmem [shape: bf16[2,32,128], index: 15, kind: input, shape index: {}]   ;;  %s4261_s16 = inlined_call_operand.vmem [shape: bf16[2,128,32], index: 16, kind: input, shape index: {}]   ;;  %s4262_s17 = inlined_call_operand.vmem [shape: f32[1,32], index: 17, kind: input, shape index: {}]   ;;  %s4263_s18 = inlined_call_operand.vmem [shape: bf16[32,32], index: 18, kind: input, shape index: {}]   ;;  %s4264_s19 = inlined_call_operand.hbm [shape: f32[2,8,32], index: 19, kind: output, shape index: {}, may-alias: {0,19}]  }
   0x1   :  { %4285 = sst [smem:[#allocation22_spill]] %s4245_s0 }
   0x2   :  { %4286 = sst [smem:[#allocation23_spill]] %s4246_s1 }
   0x3   :  { %4287 = sst [smem:[#allocation24_spill]] %s4247_s2 }
   0x4   :  { %4288 = sst [smem:[#allocation25_spill]] %s4248_s3 }
   0x5   :  { %4289 = sst [smem:[#allocation26_spill]] %s4249_s4 }
   0x6   :  { %4290 = sst [smem:[#allocation27_spill]] %s4250_s5 }
   0x7   :  { %4291 = sst [smem:[#allocation28_spill]] %s4251_s6 }
   0x8   :  { %4292 = sst [smem:[#allocation29_spill]] %s4252_s7 }
   0x9   :  { %4293 = sst [smem:[#allocation30_spill]] %s4253_s8 }
   0xa   :  { %4294 = sst [smem:[#allocation31_spill]] %s4261_s16 }
   0xb   :  { %4295 = sst [smem:[#allocation32_spill]] %s4262_s17 }
   0xc   :  { %4296 = sst [smem:[#allocation33_spill]] %s4263_s18 }
   0xd   :  { %4297 = sst [smem:[#allocation34_spill]] %s4264_s19 }
   0xe   :  { %24 = vsyncpa [#allocation3], 0 }
   0xf   :  { %26 = vsyncpa [#allocation3 + $0x1], 0 }
  0x10   :  { %27 = vsyncpa [#allocation4], 0 }
  0x11   :  { %29 = vsyncpa [#allocation4 + $0x1], 0  ;;  %s3606_s0 = smov 0   ;;  %s3608_s30 = smov 0  }
  0x12   :  { %s3610_s20 = smov 0   ;;  %s3612_s21 = smov 0  }
  0x13   :  { %s3614_s1 = smov 0   ;;  %s3616_s22 = smov 0  }
  0x14   :  { %s3618_s2 = smov 0   ;;  %s3620_s23 = smov 0  }
  0x15 LB: > { %4298 = sst [smem:[#allocation8_spill]] %s3466_s0  ;;  %s2808_s24 = sadd.s32 4294967295, %s3494_s23   ;;  %s3494_s23 = sphi %s3620_s23, %s35_s23   ;;  %s3490_s2 = sphi %s3618_s2, %s4353_s2   ;;  %s3486_s22 = sphi %s3616_s22, %s4352_s22   ;;  %s3482_s1 = sphi %s3614_s1, %s4351_s1   ;;  %s3478_s21 = sphi %s3612_s21, %s4350_s21   ;;  %s3474_s20 = sphi %s3610_s20, %s4349_s20   ;;  %s3470_s30 = sphi %s3608_s30, %s4348_s30   ;;  %s3466_s0 = sphi %s3606_s0, %s4347_s0  }
  0x16   : > { %4299 = sst [smem:[#allocation9_spill]] %s3470_s30  ;;  %s2809_s25 = sadd.s32 4294967294, %s3494_s23  }
  0x17   : > { %4300 = sst [smem:[#allocation10_spill]] %s3474_s20  ;;  %s44_s3 = sadd.s32 1, %s3486_s22 }
  0x18   : > { %4301 = sst [smem:[#allocation11_spill]] %s3482_s1  ;;  %s47_s26 = sadd.s32 1, %s3490_s2 }
  0x19   : > { %4302 = sst [smem:[#allocation12_spill]] %s3486_s22  ;;  %p45_p0 = scmp.ge.s32.totalorder %s44_s3, 2 }
  0x1a   : > { %4303 = sst [smem:[#allocation13_spill]] %s3490_s2  ;;  %s54_s27 = sadd.s32 1, %s3474_s20 }
  0x1b   : > { %4304 = sst [smem:[#allocation14_spill]] %s3494_s23  ;;  %p61_p1 = scmp.ne.s32.totalorder %s3474_s20, %s3470_s30 }
  0x1c   : > { %p62_p2 = scmp.eq.s32.totalorder %s3494_s23, 0  ;;  %s4355_s3 = smov (%p45_p0, %s44_s3), 0 }
  0x1d   : > { %4305 = sst [smem:[#allocation15_spill]] %s4355_s3  ;;  %s4357_s26 = smov (!%p45_p0, %s47_s26), %s3490_s2 }
  0x1e   : > { %p3657_p3 = por %p62_p2, %p61_p1  ;;  %p67_p4 = scmp.ne.s32.totalorder %s3470_s30, %s3466_s0 }
  0x1f   : > { %p49_p5 = scmp.ge.s32.totalorder %s4357_s26, 2  ;;  %p68_p6 = scmp.eq.s32.totalorder %s2808_s24, 0 }
  0x20   : > { %p529_p7 = scmp.eq.s32.totalorder %s2808_s24, 3  ;;  %p535_p8 = scmp.eq.s32.totalorder %s2809_s25, 3 }
  0x21   : > { %s4359_s26 = smov (%p49_p5, %s4357_s26), 0  ;;  %p3665_p9 = por %p68_p6, %p67_p4 }
  0x22   : > { %4307 = sst [smem:[#allocation16_spill]] %s4359_s26  ;;  %p3669_p10 = por %p529_p7, %p61_p1 }
  0x23   : > { %s51_s22 = ssub.s32 %s3490_s2, %s4359_s26  ;;  %p3675_p11 = por %p535_p8, %p67_p4 }
  0x24   : > { %s4309_s3 = scalar_select %p3669_p10, 1, 0 }
  0x25   : > { %s4311_s0 = scalar_select %p3675_p11, 1, 0 }
  0x26   : > { %4310 = sst [smem:[#allocation17_spill]] %s4309_s3  ;;  %p52_p12 = scmp.eq.s32.totalorder %s51_s22, 0 }
  0x27   : > { %4312 = sst [smem:[#allocation18_spill]] %s4311_s0  ;;  %p3185_p13 = scmp.lt.s32.totalorder %s3494_s23, 4 }
  0x28   : > { %s573_s24 = sand.u32 1, %s3474_s20   ;;  %s2813_s1 = sshll.u32 %s3490_s2, 7 }
  0x29   : > { %s3682_s25 = scalar_select %p52_p12, %s3474_s20, %s54_s27  }
  0x2a   : > { %s2812_s19 = sshll.u32 %s573_s24, 3  ;;  %s4314_s4 = sld [smem:[#allocation22_spill]] }
  0x2b   : > { %4313 = sst [smem:[#allocation19_spill]] %s3682_s25  ;;  %s577_s26 = scalar_lea.vmem [#allocation2], %s2812_s19 }
  0x2c   : > { %s584_s3 = sshll.u32 %s577_s26, 4  ;;  %p3694_p0 = pnand %p3185_p13, %p3657_p3  ;;  %s3690_s3 = int_to_ptr.vmem [resolvable:$true] %s584_s3 }
  0x2d   : > { %s574_s17 = scalar_lea.sflag [#allocation3], %s573_s24 }
  0x2e   : > { %p3368_p5 = pneg %p3694_p0 }
  0x30   : > { %s3688_s16 = scalar_lea.hbm %s4314_s4, %s2813_s1  ;;  %s3371_s26 = scalar_lea.hbm %s4314_s4, 256 }
  0x31   : > { %s3366_s18 = scalar_lea.hbm %s3688_s16, 128  ;;  %p3372_p3 = scmp.lt.u32.totalorder %s3688_s16, %s4314_s4 }
  0x32   : > { %p3367_p4 = scmp.ne.s32.totalorder %s3688_s16, %s3366_s18  ;;  %p3373_p8 = scmp.lt.u32.totalorder %s3371_s26, %s3366_s18 }
  0x33   : > { %p3375_p13 = scmp.lt.u32.totalorder %s3366_s18, %s3688_s16 }
  0x34   : > { %p3369_p6 = pnand %p3368_p5, %p3367_p4  ;;  %p3374_p12 = por %p3373_p8, %p3372_p3 }
  0x36   : > { %p3370_p7 = pneg %p3369_p6  ;;  %p3376_p1 = por %p3375_p13, %p3374_p12 }
  0x38   : > { %p3377_p2 = pnand %p3376_p1, %p3370_p7 }
  0x3a   : > { %3380 = shalt.err (!%p3377_p2)
}
  0x3b   : > { %s3381_s24 = scalar_lea.vmem %s3690_s3, 128  ;;  %s3496_s19 = smov [#allocation2]  }
  0x3c   : > { %p3382_p4 = scmp.ne.s32.totalorder %s3690_s3, %s3381_s24  ;;  %s3386_s1 = sshll.u32 %s3496_s19, 4  ;;  %s3387_s1 = int_to_ptr.vmem [resolvable:$false] %s3386_s1 }
  0x3d   : > { %s3388_s27 = scalar_lea.vmem %s3387_s1, 256  ;;  %p3389_p10 = scmp.lt.s32.totalorder %s3690_s3, %s3387_s1 }
  0x3e   : > { %p3384_p6 = pnand %p3382_p4, %p3368_p5  ;;  %p3390_p3 = scmp.lt.s32.totalorder %s3388_s27, %s3381_s24 }
  0x40   : > { %p3385_p11 = pneg %p3384_p6  ;;  %p3391_p8 = por %p3390_p3, %p3389_p10 }
  0x42   : > { %p3392_p12 = pnand %p3391_p8, %p3385_p11 }
  0x44   : > { %3395 = shalt.err (!%p3392_p12)
}
  0x45   : > { %3180 = dma.hbm_to_vmem [thread:$0]  (!%p3694_p0), %s3688_s16, 128, %s3690_s3, %s574_s17  }
  0x46   : > { %p4316_p1 = scmp.lt.s32.totalorder %s3494_s23, 5  ;;  %p4317_p2 = scmp.ge.s32.totalorder %s3494_s23, 1 }
  0x48   : > { %p676_p5 = pnand %p4317_p2, %p4316_p1 }
  0x4a   : > { %679 = sbr.rel (%p676_p5) target bundleno = 4019 (0xfb3), region = 96 }
  0x51   : > { %s3730_s18 = sand.u32 1, %s3470_s30  }
  0x52   : > { %4318 = sst [smem:[#allocation20_spill]] %s3730_s18  ;;  %s2815_s26 = sshll.u32 %s3730_s18, 3 }
  0x53   : > { %s682_s28 = scalar_lea.sflag [#allocation3], %s3730_s18  ;;  %s685_s24 = scalar_lea.vmem [#allocation2], %s2815_s26 }
  0x54   : > { %3457 = dma.done.wait (%p3665_p9), %s682_s28, 128  }
  0x55   : > { %3459 = vsyncadd (%p3665_p9), %s682_s28, 4294967168  ;;  %p790_p10 = scmp.lt.s32.totalorder %s3478_s21, 1  ;;  %s4320_s6 = sld [smem:[#allocation28_spill]] }
  0x56   : > { %s4321_s7 = sld [smem:[#allocation29_spill]]  ;;  %s4323_s8 = sld [smem:[#allocation30_spill]] }
  0x57   : > { %s3740_s16 = scalar_select %p790_p10, %s3478_s21, 1 }
  0x58   : > { %s4324_s4 = sld [smem:[#allocation31_spill]]  ;;  %p2831_p9 = scmp.ne.s32.totalorder %s3478_s21, 0 }
  0x59   : > { %s2906_s19 = sshll.u32 %s3740_s16, 6  ;;  %s2907_s28 = sshll.u32 %s3740_s16, 4  ;;  %v845_v0 = vld [vmem:[%s685_s24] sm:$0xff] (!%p2831_p9)  ;;  %vm846_vm0 = vcmask (!%p2831_p9), 261120  }
  0x5a   : > { %s2909_s1 = sshll.u32 %s3740_s16, 7  ;;  %s3788_s17 = scalar_lea.vmem %s4259_s14, %s2907_s28 }
  0x5b   : > { %s3750_s27 = scalar_lea.vmem %s4320_s6, %s2906_s19  ;;  %s3793_s29 = scalar_lea.vmem %s4260_s15, %s2907_s28 }
  0x5c   : > { %s3756_s25 = scalar_lea.vmem %s4321_s7, %s2907_s28  ;;  %s3761_s20 = scalar_lea.vmem %s4323_s8, %s2907_s28 }
  0x5d   : > { %4322 = sst [smem:[#allocation21_spill]] %s3756_s25  ;;  %s3779_s25 = scalar_lea.vmem %s4256_s11, %s2909_s1 }
  0x5e   : > { %s824_s8 = scalar_lea.vmem %s4258_s13, %s3740_s16  ;;  %s3798_s7 = scalar_lea.vmem %s4324_s4, %s2906_s19 }
  0x5f   : > { %s3800_s1 = scalar_lea.vmem [#allocation5], %s2815_s26  ;;  %844 = sbr.rel (%p2831_p9) target bundleno = 102 (0x66), region = 104 }
  0x60   : > { %847 = vst.msk [vmem:[%s3800_s1] sm:$0xff] (!%p2831_p9), %vm846_vm0, %v845_v0 }
  0x66 PF: > { %vm852_vm1 = vcmask 261120   ;;  %v3261_v8 = vld [vmem:[%s3750_s27] sm:$0xff]   ;;  %v3262_v9 = vld [vmem:[%s3750_s27 + $0x10] sm:$0xff]   ;;  %v3497_v10 = vmov 0.0   ;;  %v3263_v11 = vld [vmem:[%s3750_s27 + $0x8] sm:$0xff]   ;;  %vm3498_vm2 = vmmov 0   ;;  %s4330_s26 = scalar_lea.vmem %s4254_s9, %s3740_s16  ;;  %s4334_s2 = scalar_lea.vmem %s4255_s10, %s3740_s16 }
  0x67   : > { %v848_v1 = vld [vmem:[%s3800_s1] sm:$0xff]  ;;  %2985 = vmatprep.subr.bf16.mxu0 %v3497_v10  ;;  %2993 = vmatprep.subr.bf16.mxu1 %v3497_v10  ;;  %s4325_s19 = sld [smem:[#allocation27_spill]]  ;;  %s4327_s4 = sld [smem:[#allocation21_spill]]  ;;  %v3265_v20 = vld [vmem:[%s3750_s27 + $0x20] sm:$0xff]   ;;  %v3267_v23 = vld [vmem:[%s3750_s27 + $0x28] sm:$0xff]   ;;  %vm1218_vm3 = vcmask 1048064  }
  0x68   : > { %v853_v2 = vsel %vm852_vm1, %v848_v1, 0.0  ;;  %2986 = vmatpush3.bf16.msra.mxu0 %v3261_v8  ;;  %2994 = vmatpush3.bf16.msra.mxu1 %v3262_v9  ;;  %v3264_v12 = vld [vmem:[%s3750_s27 + $0x18] sm:$0xff]   ;;  %v3266_v21 = vld [vmem:[%s3750_s27 + $0x30] sm:$0xff]   ;;  %v3270_v26 = vld [vmem:[%s3761_s20] sm:$0xff]   ;;  %s4328_s3 = sld [smem:[#allocation26_spill]]  ;;  %s3500_s22 = smov 32  }
  0x69   : > { %854 = vadd.xlane.f32.xlu0 %v853_v2  ;;  %2987 = vmatprep.subr.bf16.mxu0 %v3497_v10  ;;  %v3268_v24 = vld [vmem:[%s3750_s27 + $0x38] sm:$0xff]   ;;  %v3272_v28 = vld [vmem:[%s3761_s20 + $0x8] sm:$0xff]   ;;  %s3499_s20 = smov 64   ;;  %s3501_s0 = smov 96   ;;  %vm1288_vm4 = vcmask 523264   ;;  %vm1362_vm5 = vcmask 516096  }
  0x6a   : > { %2995 = vmatprep.subr.bf16.mxu1 %v3497_v10  ;;  %2989 = vmatprep.mubr.msk.bf16.mxu0 %vm3498_vm2, %v3497_v10  ;;  %s4329_s18 = sld [smem:[#allocation25_spill]]  ;;  %s4332_s23 = sld [smem:[#allocation23_spill]] }
  0x6b   : > { %2997 = vmatprep.mubr.msk.bf16.mxu1 %vm3498_vm2, %v3497_v10  ;;  %p2897_p11 = scmp.ne.s32.totalorder %s3478_s21, 1 }
  0x6c   : > { %2988 = vmatpush3.bf16.msra.mxu0 %v3263_v11  ;;  %2996 = vmatpush3.bf16.msra.mxu1 %v3264_v12  ;;  %s4337_s5 = sld [smem:[#allocation32_spill]] (!%p2897_p11) }
  0x6d   : > { %3001 = vmatprep.subr.bf16.mxu0 %v3497_v10  ;;  %3009 = vmatprep.subr.bf16.mxu1 %v3497_v10  ;;  %s4326_s28 = scalar_lea.vmem %s4325_s19, %s3740_s16  ;;  %v3269_v25 = vld [vmem:[%s4327_s4] sm:$0xff]   ;;  %v3271_v27 = vld [vmem:[%s4327_s4 + $0x8] sm:$0xff]  }
  0x6e   : > { %v2832_v17 = vld [vmem:[%s4326_s28] ss:$0 sm:$0xff]  ;;  %s4331_s28 = sld [smem:[#allocation24_spill]] }
  0x6f   : > { %v850_v55 = vld [vmem:[%s4328_s3] sm:$0xff] }
  0xf6   : > { %v855_v3 = vpop.xlane.xlu0 %854 }
  0xf7   : > { %v857_v4 = vmul.f32 0.03125, %v855_v3 }
  0xf9   : > { %v858_v5 = vsub.f32 %v848_v1, %v857_v4 }
  0xfb   : > { %v859_v6 = vmul.f32 %v858_v5, %v858_v5 }
  0xfd   : > { %v860_v7 = vsel %vm852_vm1, %v859_v6, 0.0 }
  0xfe   : > { %861 = vadd.xlane.f32.xlu0 %v860_v7 }
 0x18b   : > { %v862_v13 = vpop.xlane.xlu0 %861 }
 0x18c   : > { %v863_v14 = vmul.f32 0.03125, %v862_v13 }
 0x18e   : > { %v864_v15 = vadd.f32 1e-05, %v863_v14 }
 0x190   : > { %3301 = vrsqrt.f32 %v864_v15 }
 0x19a   : > { %v3302_v16 = vpop.eup %3301 }
 0x19b   : > { %v866_v18 = vmul.f32 %v3302_v16, %v858_v5 }
 0x19d   : > { %v873_v19 = vmul.f32 %v2832_v17, %v866_v18  ;;  %v849_v17 = vld [vmem:[%s4329_s18] sm:$0xff]  ;;  %s4333_s18 = smov %s4332_s23 }
 0x19f   : > { %v874_v22 = vpack.c.bf16 %v873_v19, %v873_v19 }
 0x1a1   : > { %2990 = vmatmul.mubr.msk.bf16.vlgmr.msra.gmra.mrb[0].mxu0 %vm852_vm1, %v874_v22  ;;  %2998 = vmatmul.mubr.msk.bf16.vlgmr.msra.gmra.mrb[0].mxu1 %vm852_vm1, %v874_v22 }
 0x1a2   : > { %3002 = vmatpush3.bf16.msra.mxu0 %v3265_v20  ;;  %3010 = vmatpush3.bf16.msra.mxu1 %v3266_v21 }
 0x1a3   : > { %3003 = vmatprep.subr.bf16.mxu0 %v3497_v10  ;;  %3011 = vmatprep.subr.bf16.mxu1 %v3497_v10 }
 0x1a4   : > { %3005 = vmatprep.mubr.msk.bf16.mxu0 %vm3498_vm2, %v3497_v10  ;;  %3013 = vmatprep.mubr.msk.bf16.mxu1 %vm3498_vm2, %v3497_v10 }
 0x1a6   : > { %3004 = vmatpush3.bf16.msra.mxu0 %v3267_v23  ;;  %3012 = vmatpush3.bf16.msra.mxu1 %v3268_v24 }
 0x1a7   : > { %3017 = vmatprep.subr.bf16.mxu0 %v3497_v10  ;;  %3025 = vmatprep.subr.bf16.mxu1 %v3497_v10 }
 0x1a9   : > { %3006 = vmatmul.mubr.msk.bf16.vlgmr.msra.gmra.mrb[4].mxu0 %vm852_vm1, %v874_v22  ;;  %3014 = vmatmul.mubr.msk.bf16.vlgmr.msra.gmra.mrb[4].mxu1 %vm852_vm1, %v874_v22 }
 0x1aa   : > { %3018 = vmatpush3.bf16.msra.mxu0 %v3269_v25  ;;  %3026 = vmatpush3.bf16.msra.mxu1 %v3270_v26 }
 0x1ab   : > { %3019 = vmatprep.subr.bf16.mxu0 %v3497_v10  ;;  %3027 = vmatprep.subr.bf16.mxu1 %v3497_v10 }
 0x1ac   : > { %3021 = vmatprep.mubr.msk.bf16.mxu0 %vm3498_vm2, %v3497_v10  ;;  %3029 = vmatprep.mubr.msk.bf16.mxu1 %vm3498_vm2, %v3497_v10 }
 0x1ae   : > { %3020 = vmatpush3.bf16.msra.mxu0 %v3271_v27  ;;  %3028 = vmatpush3.bf16.msra.mxu1 %v3272_v28 }
 0x1af   : > { %3033 = vmatprep.subr.bf16.mxu0 %v3497_v10  ;;  %3039 = vmatprep.subr.bf16.mxu1 %v3497_v10 }
 0x1b1   : > { %3022 = vmatmul.mubr.msk.bf16.vlgmr.msra.gmra.mrb[8].mxu0 %vm852_vm1, %v874_v22  ;;  %3030 = vmatmul.mubr.msk.bf16.vlgmr.msra.gmra.mrb[8].mxu1 %vm852_vm1, %v874_v22 }
 0x1b2   : > { %3035 = vmatprep.mubr.msk.bf16.mxu0 %vm3498_vm2, %v3497_v10  ;;  %3041 = vmatprep.mubr.msk.bf16.mxu1 %vm3498_vm2, %v3497_v10 }
 0x274   : > { %v3860_v29 = vpop.f32.mrb[0].mxu0  ;;  %v3862_v30 = vpop.f32.mrb[0].mxu1 }
 0x275   : > { %1222 = vrot.lane.b32.xlu0 %v3862_v30, %s3499_s20  ;;  %v2991_v31 = vpop.f32.mrb[1].mxu0  ;;  %v2999_v32 = vpop.f32.mrb[1].mxu1  ;;  %v1214_v22 = vmul.f32 %v3860_v29, %v849_v17  ;;  %v1215_v26 = vmul.f32 %v3862_v30, %v849_v17 }
 0x276   : > { %v943_v33 = vpop.f32.mrb[2].mxu0  ;;  %v995_v34 = vpop.f32.mrb[2].mxu1 }
 0x277   : > { %v2992_v35 = vpop.f32.mrb[3].mxu0  ;;  %v3000_v36 = vpop.f32.mrb[3].mxu1 }
 0x27c   : > { %v3866_v37 = vpop.f32.mrb[4].mxu0  ;;  %v3868_v38 = vpop.f32.mrb[4].mxu1 }
 0x27d   : > { %v3007_v39 = vpop.f32.mrb[5].mxu0  ;;  %v3015_v40 = vpop.f32.mrb[5].mxu1  ;;  %v1216_v27 = vmul.f32 %v3866_v37, %v849_v17 }
 0x27e   : > { %v1047_v41 = vpop.f32.mrb[6].mxu0  ;;  %v1099_v42 = vpop.f32.mrb[6].mxu1 }
 0x27f   : > { %v3008_v43 = vpop.f32.mrb[7].mxu0  ;;  %v3016_v44 = vpop.f32.mrb[7].mxu1 }
 0x284   : > { %v1152_v45 = vpop.f32.mrb[8].mxu0  ;;  %v3870_v46 = vpop.f32.mrb[8].mxu1 }
 0x285   : > { %v3031_v47 = vpop.f32.mrb[9].mxu1  ;;  %1272 = vrot.lane.b32.xlu1 %v1152_v45, %s3499_s20  ;;  %v3023_v48 = vpop.f32.mrb[9].mxu0  ;;  %v1271_v18 = vmul.f32 %v1152_v45, %v849_v17 }
 0x286   : > { %v1155_v49 = vpop.f32.mrb[10].mxu0  ;;  %v1211_v50 = vpop.f32.mrb[10].mxu1 }
 0x287   : > { %v3024_v51 = vpop.f32.mrb[11].mxu0  ;;  %v3032_v52 = vpop.f32.mrb[11].mxu1 }
 0x289   : > { %1219 = vrot.lane.b32.xlu1 %v3860_v29, %s3499_s20 }
 0x28d   : > { %1225 = vrot.lane.b32.xlu1 %v3866_v37, %s3499_s20 }
 0x291   : > { %1228 = vrot.lane.b32.xlu1 %v3868_v38, %s3499_s20 }
 0x2e7   : > { %v1223_v60 = vpop.permute.xlu0 %1222 }
 0x2e8   : > { %v1224_v61 = vsel %vm1218_vm3, %v1223_v60, %v3862_v30 }
 0x2f7   : > { %v1273_v53 = vpop.permute.xlu1 %1272 }
 0x2f8   : > { %v1274_v54 = vsel %vm1218_vm3, %v1273_v53, %v1152_v45 }
 0x2f9   : > { %1275 = vrot.lane.b32.xlu1 %v1274_v54, %s3499_s20 }
 0x2fb   : > { %v1220_v56 = vpop.permute.xlu1 %1219 }
 0x2fc   : > { %v1221_v58 = vsel %vm1218_vm3, %v1220_v56, %v3860_v29 }
 0x2fd   : > { %1244 = vrot.lane.b32.xlu1 %v850_v55, %s3500_s22  ;;  %s4335_s22 = scalar_lea.vmem %s4257_s12, %s3740_s16  ;;  %s4336_s16 = sld [smem:[#allocation33_spill]] (!%p2897_p11) }
 0x2ff   : > { %v1226_v57 = vpop.permute.xlu1 %1225 }
 0x300   : > { %v1227_v59 = vsel %vm1218_vm3, %v1226_v57, %v3866_v37 }
 0x301   : > { %1231 = vrot.lane.b32.xlu1 %v1221_v58, %s3499_s20  ;;  %1235 = vrot.lane.b32.xlu0 %v1227_v59, %s3499_s20 }
 0x303   : > { %v1229_v62 = vpop.permute.xlu1 %1228 }
 0x304   : > { %v1230_v63 = vsel %vm1218_vm3, %v1229_v62, %v3868_v38 }
 0x305   : > { %1233 = vrot.lane.b32.xlu1 %v1224_v61, %s3499_s20 }
 0x309   : > { %1237 = vrot.lane.b32.xlu1 %v1230_v63, %s3499_s20 }
 0x36b   : > { %v1276_v0 = vpop.permute.xlu1 %1275 }
 0x36c   : > { %v1277_v1 = vsel %vm1218_vm3, %v1276_v0, %v1152_v45 }
 0x36f   : > { %v1245_v2 = vpop.permute.xlu1 %1244 }
 0x370   : > { %v1278_v3 = vmul.f32 %v1277_v1, %v1245_v2 }
 0x372   : > { %1280 = vrot.lane.b32.xlu0 %v1278_v3, %s3501_s0 }
 0x373   : > { %v1236_v4 = vpop.permute.xlu0 %1235  ;;  %v1232_v5 = vpop.permute.xlu1 %1231 }
 0x374   : > { %v1239_v6 = vsel %vm1218_vm3, %v1232_v5, %v3860_v29  ;;  %v1241_v8 = vsel %vm1218_vm3, %v1236_v4, %v3866_v37  ;;  %v3925_v29 = vld [vmem:[%s4330_s26] sm:$0x1] }
 0x375   : > { %v1247_v7 = vmul.f32 %v1245_v2, %v1239_v6  ;;  %v1249_v12 = vmul.f32 %v1245_v2, %v1241_v8  ;;  %v1361_v39 = vmul.f32 %v3925_v29, %v3925_v29 }
 0x377   : > { %1255 = vrot.lane.b32.xlu1 %v1247_v7, %s3501_s0  ;;  %v1234_v9 = vpop.permute.xlu1 %1233  ;;  %v1363_v44 = vsel %vm1362_vm5, %v1361_v39, 0.0  ;;  %v1563_v39 = vlaneseq  ;;  %vm1707_vm5 = vcmask 1043456  }
 0x378   : > { %v1240_v11 = vsel %vm1218_vm3, %v1234_v9, %v3862_v30  ;;  %v1217_v30 = vmul.f32 %v3868_v38, %v849_v17 }
 0x379   : > { %v1248_v13 = vmul.f32 %v1245_v2, %v1240_v11 }
 0x37b   : > { %1259 = vrot.lane.b32.xlu1 %v1249_v12, %s3501_s0  ;;  %1257 = vrot.lane.b32.xlu0 %v1248_v13, %s3501_s0  ;;  %v1238_v14 = vpop.permute.xlu1 %1237 }
 0x37c   : > { %v1242_v15 = vsel %vm1218_vm3, %v1238_v14, %v3868_v38 }
 0x37d   : > { %v1250_v16 = vmul.f32 %v1245_v2, %v1242_v15 }
 0x37f   : > { %1261 = vrot.lane.b32.xlu0 %v1250_v16, %s3501_s0 }
 0x3e4   : > { %v1281_v19 = vpop.permute.xlu0 %1280 }
 0x3e5   : > { %v3908_v20 = vadd.f32 %v1281_v19, %v1271_v18 }
 0x3e7   : > { %v1345_v21 = vmul.f32 %v3908_v20, %v3908_v20 }
 0x3e9   : > { %v1256_v23 = vpop.permute.xlu1 %1255  ;;  %v1346_v24 = vsel %vm1288_vm4, %v1345_v21, 0.0 }
 0x3ea   : > { %v3914_v25 = vadd.f32 %v1256_v23, %v1214_v22  ;;  %1347 = vadd.xlane.f32.xlu1 %v1346_v24 }
 0x3ec   : > { %v1284_v28 = vmul.f32 %v3914_v25, %v3914_v25 }
 0x3ed   : > { %v1258_v31 = vpop.permute.xlu0 %1257  ;;  %v1260_v32 = vpop.permute.xlu1 %1259 }
 0x3ee   : > { %v3927_v33 = vadd.f32 %v1258_v31, %v1215_v26  ;;  %v3929_v34 = vadd.f32 %v1260_v32, %v1216_v27  ;;  %v1289_v35 = vsel %vm1288_vm4, %v1284_v28, 0.0 }
 0x3ef   : > { %1290 = vadd.xlane.f32.xlu0 %v1289_v35 }
 0x3f0   : > { %v1285_v36 = vmul.f32 %v3927_v33, %v3927_v33  ;;  %v1286_v37 = vmul.f32 %v3929_v34, %v3929_v34 }
 0x3f1   : > { %v1262_v40 = vpop.permute.xlu0 %1261 }
 0x3f2   : > { %v3939_v41 = vadd.f32 %v1262_v40, %v1217_v30  ;;  %v1292_v42 = vsel %vm1288_vm4, %v1285_v36, 0.0  ;;  %v1295_v43 = vsel %vm1288_vm4, %v1286_v37, 0.0 }
 0x3f3   : > { %1293 = vadd.xlane.f32.xlu0 %v1292_v42  ;;  %1296 = vadd.xlane.f32.xlu1 %v1295_v43 }
 0x3f4   : > { %v1287_v38 = vmul.f32 %v3939_v41, %v3939_v41 }
 0x3f6   : > { %v1298_v45 = vsel %vm1288_vm4, %v1287_v38, 0.0  ;;  %v1564_v38 = vshrl.u32 %v1563_v39, 7 }
 0x3f7   : > { %1299 = vadd.xlane.f32.xlu0 %v1298_v45  ;;  %1364 = vadd.xlane.f32.xlu1 %v1363_v44 }
 0x477   : > { %v1348_v47 = vpop.xlane.xlu1 %1347 }
 0x478   : > { %3303 = vrsqrt.f32 %v1348_v47  ;;  %vm1351_vm6 = vcmp.eq.f32.partialorder %v1348_v47, inf  ;;  %v1354_v53 = vand.u32 2147483648, %v1348_v47  ;;  %vm1353_vm7 = vcmp.eq.f32.partialorder %v1348_v47, 0.0 }
 0x47c   : > { %v1291_v48 = vpop.xlane.xlu0 %1290 }
 0x47d   : > { %3305 = vrsqrt.f32 %v1291_v48  ;;  %vm1303_vm8 = vcmp.eq.f32.partialorder %v1291_v48, inf  ;;  %v1306_v61 = vand.u32 2147483648, %v1291_v48  ;;  %vm1305_vm9 = vcmp.eq.f32.partialorder %v1291_v48, 0.0 }
 0x480   : > { %v1294_v49 = vpop.xlane.xlu0 %1293  ;;  %v1297_v50 = vpop.xlane.xlu1 %1296 }
 0x481   : > { %3307 = vrsqrt.f32 %v1294_v49  ;;  %vm1310_vm10 = vcmp.eq.f32.partialorder %v1294_v49, inf  ;;  %vm1312_vm11 = vcmp.eq.f32.partialorder %v1294_v49, 0.0  ;;  %v1313_v4 = vand.u32 2147483648, %v1294_v49 }
 0x482   : > { %v3304_v51 = vpop.eup %3303  ;;  %3309 = vrsqrt.f32 %v1297_v50  ;;  %vm1317_vm12 = vcmp.eq.f32.partialorder %v1297_v50, inf  ;;  %vm1319_vm13 = vcmp.eq.f32.partialorder %v1297_v50, 0.0  ;;  %v1320_v7 = vand.u32 2147483648, %v1297_v50 }
 0x483   : > { %v1350_v52 = vmul.f32 %v3304_v51, %v1348_v47 }
 0x484   : > { %v1300_v54 = vpop.xlane.xlu0 %1299  ;;  %v1365_v55 = vpop.xlane.xlu1 %1364 }
 0x485   : > { %v1352_v56 = vsel %vm1351_vm6, %v1348_v47, %v1350_v52  ;;  %3311 = vrsqrt.f32 %v1300_v54  ;;  %vm1324_vm14 = vcmp.eq.f32.partialorder %v1300_v54, inf  ;;  %vm1368_vm15 = vcmp.eq.f32.partialorder %v1365_v55, inf }
 0x486   : > { %v1355_v57 = vsel %vm1353_vm7, %v1354_v53, %v1352_v56  ;;  %3313 = vrsqrt.f32 %v1365_v55  ;;  %v1371_v16 = vand.u32 2147483648, %v1365_v55  ;;  %v1327_v18 = vand.u32 2147483648, %v1300_v54 }
 0x487   : > { %v3306_v58 = vpop.eup %3305  ;;  %v1356_v59 = vmax.f32 %v1355_v57, 1e-12  ;;  %vm1370_vm0 = vcmp.eq.f32.partialorder %v1365_v55, 0.0  ;;  %vm1326_vm3 = vcmp.eq.f32.partialorder %v1300_v54, 0.0  ;;  %v1565_v52 = vsub.s32 0, %v1564_v38 }
 0x488   : > { %v1302_v60 = vmul.f32 %v3306_v58, %v1291_v48  ;;  %vm1592_vm6 = vcmask 64512  }
 0x489   : > { %3315 = vrcp.f32 %v1356_v59 }
 0x48a   : > { %v1304_v62 = vsel %vm1303_vm8, %v1291_v48, %v1302_v60 }
 0x48b   : > { %v3308_v63 = vpop.eup %3307  ;;  %v1307_v0 = vsel %vm1305_vm9, %v1306_v61, %v1304_v62 }
 0x48c   : > { %v3310_v1 = vpop.eup %3309  ;;  %v1329_v2 = vmax.f32 %v1307_v0, 1e-12  ;;  %v1309_v3 = vmul.f32 %v3308_v63, %v1294_v49  ;;  %v1383_v63 = vld [vmem:[%s4331_s28] sm:$0xff] }
 0x48d   : > { %v1316_v5 = vmul.f32 %v3310_v1, %v1297_v50  ;;  %v1384_v1 = vld [vmem:[%s4331_s28 + $0x8] sm:$0xff] }
 0x48e   : > { %3317 = vrcp.f32 %v1329_v2  ;;  %v1311_v6 = vsel %vm1310_vm10, %v1294_v49, %v1309_v3 }
 0x48f   : > { %v3312_v8 = vpop.eup %3311  ;;  %v1314_v9 = vsel %vm1312_vm11, %v1313_v4, %v1311_v6  ;;  %v1318_v11 = vsel %vm1317_vm12, %v1297_v50, %v1316_v5 }
 0x490   : > { %v3314_v12 = vpop.eup %3313  ;;  %v1330_v13 = vmax.f32 %v1314_v9, 1e-12  ;;  %v1321_v14 = vsel %vm1319_vm13, %v1320_v7, %v1318_v11  ;;  %v1323_v15 = vmul.f32 %v3312_v8, %v1300_v54 }
 0x491   : > { %v1331_v17 = vmax.f32 %v1321_v14, 1e-12  ;;  %v1367_v19 = vmul.f32 %v3314_v12, %v1365_v55 }
 0x492   : > { %3319 = vrcp.f32 %v1330_v13  ;;  %v1325_v21 = vsel %vm1324_vm14, %v1300_v54, %v1323_v15  ;;  %v1385_v13 = vld [vmem:[%s4331_s28 + $0x10] sm:$0xff] }
 0x493   : > { %v3316_v22 = vpop.eup %3315  ;;  %3321 = vrcp.f32 %v1331_v17  ;;  %v1328_v23 = vsel %vm1326_vm3, %v1327_v18, %v1325_v21  ;;  %v1369_v24 = vsel %vm1368_vm15, %v1365_v55, %v1367_v19 }
 0x494   : > { %v1332_v26 = vmax.f32 %v1328_v23, 1e-12  ;;  %v1372_v27 = vsel %vm1370_vm0, %v1371_v16, %v1369_v24  ;;  %v1358_v28 = vmul.f32 %v3316_v22, %v3908_v20  ;;  %v1386_v16 = vld [vmem:[%s4331_s28 + $0x18] sm:$0xff] }
 0x495   : > { %v1373_v31 = vmax.f32 %v1372_v27, 1e-12 }
 0x496   : > { %3323 = vrcp.f32 %v1332_v26  ;;  %v1359_v32 = vmul.f32 4.0, %v1358_v28 }
 0x497   : > { %3325 = vrcp.f32 %v1373_v31 }
 0x498   : > { %v3318_v35 = vpop.eup %3317  ;;  %v1378_v30 = vpack.c.bf16 %v1359_v32, %v1359_v32 }
 0x499   : > { %v1334_v36 = vmul.f32 %v3318_v35, %v3914_v25  ;;  %v3502_v35 = vmov 0  }
 0x49a   : > { %v1391_v37 = vsel %vm1288_vm4, %v1378_v30, 0  ;;  %3259 = vset.pattern.permute.xlu0 %v3502_v35  ;;  %3260 = vset.pattern.permute.xlu1 %v3502_v35 }
 0x49b   : > { %3034 = vmatpush3.bf16.xpose.msra.mxu0 %v1391_v37  ;;  %3040 = vmatpush3.bf16.xpose.msra.mxu1 %v1391_v37  ;;  %v1341_v42 = vmul.f32 4.0, %v1334_v36  ;;  %v1584_v36 = vld [vmem:[%s4332_s23] sm:$0xff] }
 0x49c   : > { %v3320_v40 = vpop.eup %3319  ;;  %3045 = vmatprep.subr.bf16.mxu0 %v3497_v10  ;;  %3051 = vmatprep.subr.bf16.mxu1 %v3497_v10 }
 0x49d   : > { %v3322_v20 = vpop.eup %3321  ;;  %v1336_v43 = vmul.f32 %v3320_v40, %v3927_v33  ;;  %v1379_v47 = vpack.c.bf16 %v1341_v42, %v1341_v42  ;;  %v1585_v40 = vld [vmem:[%s4333_s18 + $0x8] sm:$0xff] }
 0x49e   : > { %v1338_v25 = vmul.f32 %v3322_v20, %v3929_v34 }
 0x49f   : > { %v1342_v44 = vmul.f32 4.0, %v1336_v43 }
 0x4a0   : > { %v3324_v45 = vpop.eup %3323  ;;  %v1343_v33 = vmul.f32 4.0, %v1338_v25 }
 0x4a1   : > { %v3326_v48 = vpop.eup %3325  ;;  %v1380_v49 = vpack.c.bf16 %v1342_v44, %v1342_v44  ;;  %v1340_v50 = vmul.f32 %v3324_v45, %v3939_v41 }
 0x4a2   : > { %3036 = vmatmul.mubr.msk.bf16.vlgmr.msra.gmra.mrb[12].mxu0 %vm1288_vm4, %v1379_v47  ;;  %v1375_v51 = vmul.f32 %v3326_v48, %v3925_v29  ;;  %v1669_v29 = vpack.c.bf16 %v3870_v46, %v3870_v46  ;;  %v1381_v54 = vpack.c.bf16 %v1343_v33, %v1343_v33 }
 0x4a3   : > { %3042 = vmatmul.mubr.msk.bf16.vlgmr.msra.gmra.mrb[12].mxu1 %vm1288_vm4, %v1380_v49  ;;  %3046 = vmatpush3.bf16.xpose.msra.mxu0 %v1391_v37  ;;  %v1344_v34 = vmul.f32 4.0, %v1340_v50  ;;  %v1587_v50 = vld [vmem:[%s4333_s18 + $0x18] sm:$0xff] }
 0x4a4   : > { %3052 = vmatpush3.bf16.xpose.msra.mxu1 %v1391_v37  ;;  %3047 = vmatprep.mubr.msk.bf16.mxu0 %vm3498_vm2, %v3497_v10  ;;  %v1376_v53 = vmul.f32 4.0, %v1375_v51  ;;  %v3968_v60 = vsel %vm1707_vm5, %v1669_v29, 0 }
 0x4a5   : > { %3053 = vmatprep.mubr.msk.bf16.mxu1 %vm3498_vm2, %v3497_v10  ;;  %3057 = vmatprep.subr.bf16.mxu0 %v3497_v10  ;;  %v1382_v57 = vpack.c.bf16 %v1344_v34, %v1344_v34 }
 0x4a6   : > { %3063 = vmatprep.subr.bf16.mxu1 %v3497_v10  ;;  %v1566_v41 = vrot.slane %v1376_v53, %v1565_v52 }
 0x4a8   : > { %v1568_v55 = vmul.f32 %v1566_v41, %v1341_v42  ;;  %v1571_v56 = vmul.f32 %v1566_v41, %v1344_v34  ;;  %v1569_v59 = vmul.f32 %v1566_v41, %v1342_v44  ;;  %v1570_v61 = vmul.f32 %v1566_v41, %v1343_v33  ;;  %v1586_v44 = vld [vmem:[%s4333_s18 + $0x10] sm:$0xff] }
 0x4aa   : > { %3048 = vmatmul.mubr.msk.bf16.vlgmr.msra.gmra.mrb[16].mxu0 %vm1288_vm4, %v1381_v54  ;;  %v1572_v58 = vsel %vm1288_vm4, %v1568_v55, 0.0  ;;  %v1575_v46 = vsel %vm1288_vm4, %v1569_v59, 0.0  ;;  %v1578_v62 = vsel %vm1288_vm4, %v1570_v61, 0.0  ;;  %v1581_v27 = vsel %vm1288_vm4, %v1571_v56, 0.0 }
 0x4ab   : > { %1573 = vadd.xlane.f32.xlu0 %v1572_v58  ;;  %3054 = vmatmul.mubr.msk.bf16.vlgmr.msra.gmra.mrb[16].mxu1 %vm1288_vm4, %v1382_v57 }
 0x4ac   : > { %3058 = vmatpush3.bf16.msra.mxu0 %v3968_v60  ;;  %3064 = vmatpush3.bf16.msra.mxu1 %v3968_v60 }
 0x4ad   : > { %3059 = vmatprep.mubr.msk.bf16.mxu0 %vm3498_vm2, %v3497_v10  ;;  %3069 = vmatprep.subr.bf16.mxu0 %v3497_v10 }
 0x4ae   : > { %3065 = vmatprep.mubr.msk.bf16.mxu1 %vm3498_vm2, %v3497_v10  ;;  %3075 = vmatprep.subr.bf16.mxu1 %v3497_v10 }
 0x4af   : > { %1576 = vadd.xlane.f32.xlu0 %v1575_v46 }
 0x4b3   : > { %1579 = vadd.xlane.f32.xlu0 %v1578_v62 }
 0x538   : > { %v1574_v30 = vpop.xlane.xlu0 %1573 }
 0x539   : > { %v4007_v39 = vadd.f32 %v1584_v36, %v1574_v30 }
 0x53c   : > { %v1577_v37 = vpop.xlane.xlu0 %1576 }
 0x53d   : > { %v4015_v43 = vadd.f32 %v1585_v40, %v1577_v37 }
 0x540   : > { %v1580_v45 = vpop.xlane.xlu0 %1579 }
 0x541   : > { %v4024_v48 = vadd.f32 %v1586_v44, %v1580_v45  ;;  %v3280_v44 = vld [vmem:[%s3779_s25 + $0x50] sm:$0xff]  }
 0x575   : > { %v1427_v0 = vpop.f32.mrb[12].mxu0 }
 0x576   : > { %v3987_v2 = vadd.f32 %v1427_v0, %v1383_v63  ;;  %v3037_v3 = vpop.f32.mrb[13].mxu0  ;;  %v1470_v4 = vpop.f32.mrb[12].mxu1 }
 0x577   : > { %v1430_v5 = vpop.f32.mrb[14].mxu0  ;;  %v3043_v6 = vpop.f32.mrb[13].mxu1  ;;  %v3989_v7 = vadd.f32 %v1470_v4, %v1384_v1 }
 0x578   : > { %v3038_v8 = vpop.f32.mrb[15].mxu0  ;;  %v1473_v9 = vpop.f32.mrb[14].mxu1  ;;  %v1593_v11 = vsel %vm1592_vm6, %v3987_v2, -inf }
 0x579   : > { %v3044_v12 = vpop.f32.mrb[15].mxu1  ;;  %1594 = vmax.xlane.f32.xlu1 %v1593_v11  ;;  %v1596_v14 = vsel %vm1592_vm6, %v3989_v7, -inf }
 0x57d   : > { %1597 = vmax.xlane.f32.xlu1 %v1596_v14  ;;  %v1513_v15 = vpop.f32.mrb[16].mxu0 }
 0x57e   : > { %v1514_v17 = vadd.f32 %v1513_v15, %v1385_v13  ;;  %v3049_v18 = vpop.f32.mrb[17].mxu0  ;;  %v1556_v19 = vpop.f32.mrb[16].mxu1 }
 0x57f   : > { %v1516_v21 = vpop.f32.mrb[18].mxu0  ;;  %v3055_v22 = vpop.f32.mrb[17].mxu1  ;;  %v1557_v23 = vadd.f32 %v1556_v19, %v1386_v16  ;;  %v3273_v19 = vld [vmem:[%s3779_s25] sm:$0xff]  }
 0x580   : > { %v3050_v24 = vpop.f32.mrb[19].mxu0  ;;  %v1559_v26 = vpop.f32.mrb[18].mxu1  ;;  %v1599_v28 = vsel %vm1592_vm6, %v1514_v17, -inf  ;;  %v3276_v21 = vld [vmem:[%s3779_s25 + $0x40] sm:$0xff]   ;;  %v3274_v22 = vld [vmem:[%s3779_s25 + $0x8] sm:$0xff]  }
 0x581   : > { %v3056_v31 = vpop.f32.mrb[19].mxu1  ;;  %1582 = vadd.xlane.f32.xlu1 %v1581_v27  ;;  %1600 = vmax.xlane.f32.xlu0 %v1599_v28  ;;  %v1602_v32 = vsel %vm1592_vm6, %v1557_v23, -inf }
 0x585   : > { %1603 = vmax.xlane.f32.xlu1 %v1602_v32 }
 0x606   : > { %v1595_v42 = vpop.xlane.xlu1 %1594 }
 0x607   : > { %v4013_v20 = vmax.f32 %v1595_v42, %v4007_v39 }
 0x609   : > { %v1641_v38 = vsub.f32 %v4007_v39, %v4013_v20  ;;  %1611 = vperm.xlu0 %3259, %v4013_v20   ;;  %v3277_v20 = vld [vmem:[%s3779_s25 + $0x18] sm:$0xff]  }
 0x60a   : > { %v1598_v47 = vpop.xlane.xlu1 %1597 }
 0x60b   : > { %v1606_v25 = vmax.f32 %v1598_v47, %v4015_v43  ;;  %v1645_v15 = vmul.f32 1.442695, %v1641_v38  ;;  %v3282_v47 = vld [vmem:[%s3779_s25 + $0x58] sm:$0xff]  }
 0x60d   : > { %v1642_v49 = vsub.f32 %v4015_v43, %v1606_v25  ;;  %1616 = vperm.xlu1 %3260, %v1606_v25   ;;  %v3278_v43 = vld [vmem:[%s3779_s25 + $0x48] sm:$0xff]  }
 0x60e   : > { %v1583_v51 = vpop.xlane.xlu1 %1582  ;;  %v1601_v52 = vpop.xlane.xlu0 %1600 }
 0x60f   : > { %v4031_v33 = vmax.f32 %v1601_v52, %v4024_v48  ;;  %v4033_v53 = vadd.f32 %v1587_v50, %v1583_v51  ;;  %v1647_v16 = vmul.f32 1.442695, %v1642_v49 }
 0x611   : > { %v1643_v34 = vsub.f32 %v4024_v48, %v4031_v33  ;;  %1621 = vperm.xlu1 %3260, %v4031_v33  }
 0x612   : > { %v1604_v41 = vpop.xlane.xlu1 %1603 }
 0x613   : > { %v4039_v29 = vmax.f32 %v1604_v41, %v4033_v53  ;;  %v1649_v24 = vmul.f32 1.442695, %v1643_v34 }
 0x615   : > { %v1644_v54 = vsub.f32 %v4033_v53, %v4039_v29  ;;  %1626 = vperm.xlu1 %3260, %v4039_v29  }
 0x617   : > { %v1651_v26 = vmul.f32 1.442695, %v1644_v54 }
 0x688   : > { %v1612_v55 = vpop.permute.xlu0 %1611 }
 0x689   : > { %v1629_v56 = vsub.f32 %v3987_v2, %v1612_v55 }
 0x68b   : > { %v1633_v57 = vmul.f32 1.442695, %v1629_v56 }
 0x68c   : > { %v1617_v58 = vpop.permute.xlu1 %1616 }
 0x68d   : > { %3327 = vpow2.f32 %v1633_v57  ;;  %v1630_v59 = vsub.f32 %v3989_v7, %v1617_v58 }
 0x68f   : > { %v1635_v46 = vmul.f32 1.442695, %v1630_v59 }
 0x690   : > { %v1622_v61 = vpop.permute.xlu1 %1621 }
 0x691   : > { %3329 = vpow2.f32 %v1635_v46  ;;  %v1631_v62 = vsub.f32 %v1514_v17, %v1622_v61  ;;  %v2855_v46 = vld [vmem:[%s4334_s2] ss:$0 sm:$0xff] }
 0x693   : > { %v1637_v63 = vmul.f32 1.442695, %v1631_v62 }
 0x694   : > { %v1627_v0 = vpop.permute.xlu1 %1626 }
 0x695   : > { %3331 = vpow2.f32 %v1637_v63  ;;  %v1632_v1 = vsub.f32 %v1557_v23, %v1627_v0  ;;  %v3275_v23 = vld [vmem:[%s3779_s25 + $0x10] sm:$0xff]  }
 0x697   : > { %v3328_v3 = vpop.eup %3327  ;;  %v1639_v4 = vmul.f32 1.442695, %v1632_v1 }
 0x698   : > { %v1653_v5 = vsel %vm1592_vm6, %v3328_v3, 0.0  ;;  %v1670_v6 = vpack.c.bf16 %v3328_v3, %v3328_v3  ;;  %v3279_v3 = vld [vmem:[%s3779_s25 + $0x20] sm:$0xff]  }
 0x699   : > { %3333 = vpow2.f32 %v1639_v4  ;;  %1654 = vadd.xlane.f32.xlu1 %v1653_v5 }
 0x69a   : > { %3060 = vmatmul.mubr.msk.bf16.vlgmr.msra.gmra.mrb[20].mxu0 %vm1592_vm6, %v1670_v6  ;;  %3335 = vpow2.f32 %v1645_v15 }
 0x69b   : > { %v3330_v2 = vpop.eup %3329  ;;  %3070 = vmatpush3.bf16.msra.mxu0 %v3968_v60  ;;  %3071 = vmatprep.mubr.msk.bf16.mxu0 %vm3498_vm2, %v3497_v10  ;;  %3337 = vpow2.f32 %v1647_v16  ;;  %v3284_v16 = vld [vmem:[%s3779_s25 + $0x38] sm:$0xff]  }
 0x69c   : > { %v1656_v7 = vsel %vm1592_vm6, %v3330_v2, 0.0  ;;  %v1671_v8 = vpack.c.bf16 %v3330_v2, %v3330_v2  ;;  %3105 = vmatprep.subr.bf16.mxu0 %v3497_v10  ;;  %3339 = vpow2.f32 %v1649_v24  ;;  %v3281_v2 = vld [vmem:[%s3779_s25 + $0x28] sm:$0xff]   ;;  %v3287_v24 = vld [vmem:[%s3779_s25 + $0x70] sm:$0xff]  }
 0x69d   : > { %1657 = vadd.xlane.f32.xlu0 %v1656_v7  ;;  %3341 = vpow2.f32 %v1651_v26 }
 0x69e   : > { %3066 = vmatmul.mubr.msk.bf16.vlgmr.msra.gmra.mrb[20].mxu1 %vm1592_vm6, %v1671_v8 }
 0x69f   : > { %v3332_v9 = vpop.eup %3331  ;;  %3076 = vmatpush3.bf16.msra.mxu1 %v3968_v60  ;;  %3077 = vmatprep.mubr.msk.bf16.mxu1 %vm3498_vm2, %v3497_v10 }
 0x6a0   : > { %v1659_v11 = vsel %vm1592_vm6, %v3332_v9, 0.0  ;;  %v1672_v12 = vpack.c.bf16 %v3332_v9, %v3332_v9  ;;  %3081 = vmatprep.subr.bf16.mxu1 %v3497_v10 }
 0x6a1   : > { %1660 = vadd.xlane.f32.xlu1 %v1659_v11 }
 0x6a2   : > { %3072 = vmatmul.mubr.msk.bf16.vlgmr.msra.gmra.mrb[24].mxu0 %vm1592_vm6, %v1672_v12  ;;  %v3283_v12 = vld [vmem:[%s3779_s25 + $0x30] sm:$0xff]  }
 0x6a3   : > { %v3334_v13 = vpop.eup %3333  ;;  %3113 = vmatprep.mubr.msk.bf16.mxu0 %vm3498_vm2, %v3497_v10  ;;  %3106 = vmatpush3.bf16.msra.mxu0 %v3276_v21 }
 0x6a4   : > { %v1662_v14 = vsel %vm1592_vm6, %v3334_v13, 0.0  ;;  %v1673_v60 = vpack.c.bf16 %v3334_v13, %v3334_v13  ;;  %v3336_v17 = vpop.eup %3335  ;;  %3107 = vmatprep.subr.bf16.mxu0 %v3497_v10 }
 0x6a5   : > { %1663 = vadd.xlane.f32.xlu1 %v1662_v14  ;;  %v3338_v18 = vpop.eup %3337 }
 0x6a6   : > { %3078 = vmatmul.mubr.msk.bf16.vlgmr.msra.gmra.mrb[24].mxu1 %vm1592_vm6, %v1673_v60  ;;  %v3340_v35 = vpop.eup %3339 }
 0x6a7   : > { %3089 = vmatprep.mubr.msk.bf16.mxu1 %vm3498_vm2, %v3497_v10  ;;  %3082 = vmatpush3.bf16.msra.mxu1 %v3273_v19  ;;  %v3342_v37 = vpop.eup %3341 }
 0x6a8   : > { %3083 = vmatprep.subr.bf16.mxu1 %v3497_v10  ;;  %3108 = vmatpush3.bf16.msra.mxu0 %v3278_v43 }
 0x6a9   : > { %3109 = vmatprep.subr.bf16.mxu0 %v3497_v10 }
 0x6ab   : > { %3084 = vmatpush3.bf16.msra.mxu1 %v3274_v22  ;;  %v3286_v22 = vld [vmem:[%s3779_s25 + $0x68] sm:$0xff]  }
 0x6ac   : > { %3085 = vmatprep.subr.bf16.mxu1 %v3497_v10  ;;  %3110 = vmatpush3.bf16.msra.mxu0 %v3280_v44 }
 0x6ad   : > { %3111 = vmatprep.subr.bf16.mxu0 %v3497_v10 }
 0x6af   : > { %3086 = vmatpush3.bf16.msra.mxu1 %v3275_v23 }
 0x6b0   : > { %3087 = vmatprep.subr.bf16.mxu1 %v3497_v10  ;;  %3112 = vmatpush3.bf16.msra.mxu0 %v3282_v47 }
 0x6b1   : > { %3129 = vmatprep.subr.bf16.mxu0 %v3497_v10 }
 0x6b3   : > { %3088 = vmatpush3.bf16.msra.mxu1 %v3277_v20 }
 0x6b4   : > { %3093 = vmatprep.subr.bf16.mxu1 %v3497_v10 }
 0x6b6   : > { %1676 = vperm.xlu1 %3260, %v3336_v17  }
 0x6ba   : > { %1681 = vperm.xlu1 %3260, %v3338_v18  }
 0x726   : > { %v1655_v27 = vpop.xlane.xlu1 %1654 }
 0x727   : > { %v1665_v28 = vadd.f32 %v3336_v17, %v1655_v27 }
 0x729   : > { %3343 = vrcp.f32 %v1665_v28  ;;  %v3288_v28 = vld [vmem:[%s3779_s25 + $0x78] sm:$0xff]  }
 0x72a   : > { %v1658_v31 = vpop.xlane.xlu0 %1657 }
 0x72b   : > { %v1666_v32 = vadd.f32 %v3338_v18, %v1658_v31  ;;  %v3285_v18 = vld [vmem:[%s3779_s25 + $0x60] sm:$0xff]  }
 0x72d   : > { %3345 = vrcp.f32 %v1666_v32 }
 0x72e   : > { %v1661_v30 = vpop.xlane.xlu1 %1660 }
 0x72f   : > { %v1667_v36 = vadd.f32 %v3340_v35, %v1661_v30 }
 0x731   : > { %3347 = vrcp.f32 %v1667_v36 }
 0x732   : > { %v1664_v39 = vpop.xlane.xlu1 %1663 }
 0x733   : > { %v3344_v40 = vpop.eup %3343  ;;  %v1668_v42 = vadd.f32 %v3342_v37, %v1664_v39 }
 0x734   : > { %1886 = vperm.xlu0 %3259, %v3344_v40  }
 0x735   : > { %3349 = vrcp.f32 %v1668_v42 }
 0x736   : > { %v1677_v61 = vpop.permute.xlu1 %1676 }
 0x737   : > { %v3346_v38 = vpop.eup %3345  ;;  %v1700_v62 = vmul.f32 %v2855_v46, %v1677_v61 }
 0x738   : > { %1686 = vperm.xlu0 %3259, %v3340_v35   ;;  %1891 = vperm.xlu1 %3260, %v3346_v38  }
 0x73a   : > { %v1682_v8 = vpop.permute.xlu1 %1681 }
 0x73b   : > { %v3348_v45 = vpop.eup %3347  ;;  %v1701_v13 = vmul.f32 %v2855_v46, %v1682_v8 }
 0x73c   : > { %1896 = vperm.xlu0 %3259, %v3348_v45   ;;  %1691 = vperm.xlu1 %3260, %v3342_v37  }
 0x73f   : > { %v3350_v25 = vpop.eup %3349 }
 0x740   : > { %1901 = vperm.xlu1 %3260, %v3350_v25  }
 0x76d   : > { %v1745_v48 = vpop.f32.mrb[20].mxu0 }
 0x76e   : > { %v3061_v49 = vpop.f32.mrb[21].mxu0  ;;  %v1746_v63 = vadd.f32 %v1745_v48, %v1700_v62 }
 0x76f   : > { %v1748_v50 = vpop.f32.mrb[22].mxu0 }
 0x770   : > { %v3062_v51 = vpop.f32.mrb[23].mxu0 }
 0x771   : > { %v1788_v52 = vpop.f32.mrb[20].mxu1 }
 0x772   : > { %v3067_v33 = vpop.f32.mrb[21].mxu1  ;;  %v1789_v15 = vadd.f32 %v1788_v52, %v1701_v13  ;;  %v3291_v13 = vld [vmem:[%s3788_s17 + $0x8] sm:$0xff]  }
 0x773   : > { %v1791_v53 = vpop.f32.mrb[22].mxu1 }
 0x774   : > { %v3068_v34 = vpop.f32.mrb[23].mxu1 }
 0x775   : > { %v1831_v41 = vpop.f32.mrb[24].mxu0 }
 0x776   : > { %v3073_v29 = vpop.f32.mrb[25].mxu0 }
 0x777   : > { %v1834_v54 = vpop.f32.mrb[26].mxu0 }
 0x778   : > { %v3074_v55 = vpop.f32.mrb[27].mxu0 }
 0x779   : > { %v1874_v56 = vpop.f32.mrb[24].mxu1 }
 0x77a   : > { %v3079_v57 = vpop.f32.mrb[25].mxu1 }
 0x77b   : > { %v1877_v58 = vpop.f32.mrb[26].mxu1 }
 0x77c   : > { %v3080_v59 = vpop.f32.mrb[27].mxu1 }
 0x7b3   : > { %v1887_v0 = vpop.permute.xlu0 %1886 }
 0x7b4   : > { %v1904_v1 = vmul.f32 %v1887_v0, %v1746_v63  ;;  %v2880_v63 = vld [vmem:[%s4335_s22] ss:$0 sm:$0xff] }
 0x7b6   : > { %v1908_v4 = vpack.c.bf16 %v1904_v1, %v1904_v1 }
 0x7b7   : > { %v1687_v5 = vpop.permute.xlu0 %1686  ;;  %v1892_v60 = vpop.permute.xlu1 %1891 }
 0x7b8   : > { %v1702_v6 = vmul.f32 %v2855_v46, %v1687_v5  ;;  %3090 = vmatmul.mubr.msk.bf16.vlgmr.msra.gmra.mrb[28].mxu1 %vm1288_vm4, %v1908_v4  ;;  %v1905_v17 = vmul.f32 %v1892_v60, %v1789_v15 }
 0x7b9   : > { %3094 = vmatpush3.bf16.msra.mxu1 %v3279_v3  ;;  %3101 = vmatprep.mubr.msk.bf16.mxu1 %vm3498_vm2, %v3497_v10  ;;  %v3359_v3 = vld [vmem:[%s3800_s1] sm:$0xff] }
 0x7ba   : > { %v1832_v7 = vadd.f32 %v1831_v41, %v1702_v6  ;;  %3095 = vmatprep.subr.bf16.mxu1 %v3497_v10  ;;  %v1909_v19 = vpack.c.bf16 %v1905_v17, %v1905_v17 }
 0x7bb   : > { %v1897_v9 = vpop.permute.xlu0 %1896  ;;  %v1692_v21 = vpop.permute.xlu1 %1691 }
 0x7bc   : > { %v1906_v11 = vmul.f32 %v1897_v9, %v1832_v7  ;;  %v1703_v23 = vmul.f32 %v2855_v46, %v1692_v21 }
 0x7bd   : > { %3096 = vmatpush3.bf16.msra.mxu1 %v3281_v2 }
 0x7be   : > { %v1910_v14 = vpack.c.bf16 %v1906_v11, %v1906_v11  ;;  %3097 = vmatprep.subr.bf16.mxu1 %v3497_v10  ;;  %v1875_v26 = vadd.f32 %v1874_v56, %v1703_v23  ;;  %v3289_v11 = vld [vmem:[%s3788_s17] sm:$0xff]  }
 0x7bf   : > { %v1902_v27 = vpop.permute.xlu1 %1901  ;;  %v3293_v23 = vld [vmem:[%s3798_s7] sm:$0xff]  }
 0x7c0   : > { %3114 = vmatmul.mubr.msk.bf16.vlgmr.msra.gmra.mrb[28].mxu0 %vm1288_vm4, %v1910_v14  ;;  %v1907_v31 = vmul.f32 %v1902_v27, %v1875_v26  ;;  %v3292_v14 = vld [vmem:[%s3793_s29 + $0x8] sm:$0xff]   ;;  %v3295_v26 = vld [vmem:[%s3798_s7 + $0x10] sm:$0xff]   ;;  %v3296_v27 = vld [vmem:[%s3798_s7 + $0x18] sm:$0xff]  }
 0x7c1   : > { %3098 = vmatpush3.bf16.msra.mxu1 %v3283_v12  ;;  %3133 = vmatprep.mubr.msk.bf16.mxu0 %vm3498_vm2, %v3497_v10  ;;  %v3290_v12 = vld [vmem:[%s3793_s29] sm:$0xff]  }
 0x7c2   : > { %3099 = vmatprep.subr.bf16.mxu1 %v3497_v10  ;;  %v1911_v32 = vpack.c.bf16 %v1907_v31, %v1907_v31  ;;  %3130 = vmatpush3.bf16.msra.mxu0 %v3289_v11  ;;  %v3298_v31 = vld [vmem:[%s3798_s7 + $0x28] sm:$0xff]  }
 0x7c3   : > { %3131 = vmatprep.subr.bf16.mxu0 %v3497_v10 }
 0x7c5   : > { %3100 = vmatpush3.bf16.msra.mxu1 %v3284_v16 }
 0x7c6   : > { %3117 = vmatprep.subr.bf16.mxu1 %v3497_v10  ;;  %3132 = vmatpush3.bf16.msra.mxu0 %v3291_v13 }
 0x7c7   : > { %3145 = vmatprep.subr.bf16.mxu0 %v3497_v10 }
 0x7c8   : > { %3102 = vmatmul.mubr.msk.bf16.vlgmr.msra.gmra.mrb[32].mxu1 %vm1288_vm4, %v1909_v19 }
 0x7c9   : > { %3118 = vmatpush3.bf16.msra.mxu1 %v3285_v18  ;;  %3125 = vmatprep.mubr.msk.bf16.mxu1 %vm3498_vm2, %v3497_v10  ;;  %v2881_v18 = vld [vmem:[%s824_s8] ss:$0 sm:$0xff] }
 0x7ca   : > { %3119 = vmatprep.subr.bf16.mxu1 %v3497_v10 }
 0x7cd   : > { %3120 = vmatpush3.bf16.msra.mxu1 %v3286_v22 }
 0x7ce   : > { %3121 = vmatprep.subr.bf16.mxu1 %v3497_v10 }
 0x7d1   : > { %3122 = vmatpush3.bf16.msra.mxu1 %v3287_v24  ;;  %v3294_v24 = vld [vmem:[%s3798_s7 + $0x8] sm:$0xff]  }
 0x7d2   : > { %3123 = vmatprep.subr.bf16.mxu1 %v3497_v10 }
 0x7d5   : > { %3124 = vmatpush3.bf16.msra.mxu1 %v3288_v28  ;;  %v3297_v28 = vld [vmem:[%s3798_s7 + $0x20] sm:$0xff]  }
 0x7d6   : > { %3137 = vmatprep.subr.bf16.mxu1 %v3497_v10 }
 0x7d8   : > { %3126 = vmatmul.mubr.msk.bf16.vlgmr.msra.gmra.mrb[36].mxu1 %vm1288_vm4, %v1911_v32  ;;  %v3299_v32 = vld [vmem:[%s3798_s7 + $0x30] sm:$0xff]  }
 0x7d9   : > { %3141 = vmatprep.mubr.msk.bf16.mxu1 %vm3498_vm2, %v3497_v10  ;;  %3138 = vmatpush3.bf16.msra.mxu1 %v3290_v12 }
 0x7da   : > { %3139 = vmatprep.subr.bf16.mxu1 %v3497_v10 }
 0x7dd   : > { %3140 = vmatpush3.bf16.msra.mxu1 %v3292_v14 }
 0x88b   : > { %v2005_v35 = vpop.f32.mrb[28].mxu1 }
 0x88c   : > { %v3091_v30 = vpop.f32.mrb[29].mxu1  ;;  %v2212_v38 = vsel %vm852_vm1, %v2005_v35, 0.0  ;;  %v3300_v35 = vld [vmem:[%s3798_s7 + $0x38] sm:$0xff]  }
 0x88d   : > { %v2008_v36 = vpop.f32.mrb[30].mxu1 }
 0x88e   : > { %v3092_v37 = vpop.f32.mrb[31].mxu1 }
 0x893   : > { %v2139_v39 = vpop.f32.mrb[28].mxu0 }
 0x894   : > { %v3115_v40 = vpop.f32.mrb[29].mxu0  ;;  %v2215_v48 = vsel %vm852_vm1, %v2139_v39, 0.0 }
 0x895   : > { %v2142_v42 = vpop.f32.mrb[30].mxu0 }
 0x896   : > { %v3116_v20 = vpop.f32.mrb[31].mxu0 }
 0x89b   : > { %v2072_v43 = vpop.f32.mrb[32].mxu1 }
 0x89c   : > { %v2213_v44 = vsel %vm852_vm1, %v2072_v43, 0.0  ;;  %v3103_v45 = vpop.f32.mrb[33].mxu1 }
 0x89d   : > { %v2214_v47 = vadd.f32 %v2213_v44, %v2212_v38  ;;  %v2075_v25 = vpop.f32.mrb[34].mxu1 }
 0x89e   : > { %v3104_v49 = vpop.f32.mrb[35].mxu1 }
 0x89f   : > { %v2216_v50 = vadd.f32 %v2215_v48, %v2214_v47 }
 0x8ab   : > { %v2206_v51 = vpop.f32.mrb[36].mxu1 }
 0x8ac   : > { %v2217_v52 = vsel %vm852_vm1, %v2206_v51, 0.0  ;;  %v3127_v33 = vpop.f32.mrb[37].mxu1 }
 0x8ad   : > { %v2218_v53 = vadd.f32 %v2217_v52, %v2216_v50  ;;  %v2209_v34 = vpop.f32.mrb[38].mxu1 }
 0x8ae   : > { %v3128_v41 = vpop.f32.mrb[39].mxu1 }
 0x8af   : > { %v2220_v29 = vsel %vm852_vm1, %v2218_v53, 0.0 }
 0x8b0   : > { %2221 = vadd.xlane.f32.xlu0 %v2220_v29 }
 0x93d   : > { %v2222_v54 = vpop.xlane.xlu0 %2221 }
 0x93e   : > { %v2223_v55 = vmul.f32 0.03125, %v2222_v54 }
 0x940   : > { %v2224_v56 = vsub.f32 %v2218_v53, %v2223_v55 }
 0x942   : > { %v2225_v57 = vmul.f32 %v2224_v56, %v2224_v56 }
 0x944   : > { %v2226_v58 = vsel %vm852_vm1, %v2225_v57, 0.0 }
 0x945   : > { %2227 = vadd.xlane.f32.xlu1 %v2226_v58 }
 0x9d2   : > { %v2228_v59 = vpop.xlane.xlu1 %2227 }
 0x9d3   : > { %v2229_v46 = vmul.f32 0.03125, %v2228_v59 }
 0x9d5   : > { %v2230_v61 = vadd.f32 1e-05, %v2229_v46  ;;  %v3360_v46 = vld [vmem:[%s4336_s16] sm:$0xff] (!%p2897_p11)  }
 0x9d7   : > { %3351 = vrsqrt.f32 %v2230_v61  ;;  %v3503_v61 = vmov (!%p2897_p11), 0.0  }
 0x9e1   : > { %v3352_v62 = vpop.eup %3351 }
 0x9e2   : > { %v2232_v0 = vmul.f32 %v3352_v62, %v2224_v56  ;;  %v3361_v62 = vld [vmem:[%s4336_s16 + $0x8] sm:$0xff] (!%p2897_p11)  }
 0x9e4   : > { %v2239_v1 = vmul.f32 %v2880_v63, %v2232_v0 }
 0x9e6   : > { %v4136_v4 = vadd.f32 %v3359_v3, %v2239_v1 }
 0x9e8   : > { %v2242_v5 = vsel %vm852_vm1, %v4136_v4, 0.0 }
 0x9e9   : > { %2243 = vadd.xlane.f32.xlu0 %v2242_v5 }
 0xa76   : > { %v2244_v6 = vpop.xlane.xlu0 %2243 }
 0xa77   : > { %v2245_v2 = vmul.f32 0.03125, %v2244_v6 }
 0xa79   : > { %v2246_v7 = vsub.f32 %v4136_v4, %v2245_v2 }
 0xa7b   : > { %v2247_v8 = vmul.f32 %v2246_v7, %v2246_v7 }
 0xa7d   : > { %v2248_v9 = vsel %vm852_vm1, %v2247_v8, 0.0 }
 0xa7e   : > { %2249 = vadd.xlane.f32.xlu0 %v2248_v9 }
 0xb0b   : > { %v2250_v60 = vpop.xlane.xlu0 %2249 }
 0xb0c   : > { %v2251_v15 = vmul.f32 0.03125, %v2250_v60 }
 0xb0e   : > { %v2252_v16 = vadd.f32 1e-05, %v2251_v15 }
 0xb10   : > { %3353 = vrsqrt.f32 %v2252_v16 }
 0xb1a   : > { %v3354_v17 = vpop.eup %3353 }
 0xb1b   : > { %v2254_v19 = vmul.f32 %v3354_v17, %v2246_v7 }
 0xb1d   : > { %v2261_v21 = vmul.f32 %v2881_v18, %v2254_v19 }
 0xb1f   : > { %v2262_v22 = vpack.c.bf16 %v2261_v21, %v2261_v21 }
 0xb21   : > { %3134 = vmatmul.mubr.msk.bf16.vlgmr.msra.gmra.mrb[32].mxu0 %vm852_vm1, %v2262_v22  ;;  %3142 = vmatmul.mubr.msk.bf16.vlgmr.msra.gmra.mrb[40].mxu1 %vm852_vm1, %v2262_v22 }
 0xb22   : > { %3161 = vmatprep.mubr.msk.bf16.mxu0 %vm3498_vm2, %v3497_v10  ;;  %3146 = vmatpush3.bf16.msra.mxu0 %v3293_v23  ;;  %vm3504_vm2 = vmmov (!%p2897_p11), 0  }
 0xb23   : > { %3147 = vmatprep.subr.bf16.mxu0 %v3497_v10 }
 0xb26   : > { %3148 = vmatpush3.bf16.msra.mxu0 %v3294_v24 }
 0xb27   : > { %3149 = vmatprep.subr.bf16.mxu0 %v3497_v10 }
 0xb2a   : > { %3150 = vmatpush3.bf16.msra.mxu0 %v3295_v26 }
 0xb2b   : > { %3151 = vmatprep.subr.bf16.mxu0 %v3497_v10 }
 0xb2e   : > { %3152 = vmatpush3.bf16.msra.mxu0 %v3296_v27 }
 0xb2f   : > { %3153 = vmatprep.subr.bf16.mxu0 %v3497_v10 }
 0xb32   : > { %3154 = vmatpush3.bf16.msra.mxu0 %v3297_v28 }
 0xb33   : > { %3155 = vmatprep.subr.bf16.mxu0 %v3497_v10 }
 0xb36   : > { %3156 = vmatpush3.bf16.msra.mxu0 %v3298_v31 }
 0xb37   : > { %3157 = vmatprep.subr.bf16.mxu0 %v3497_v10 }
 0xb3a   : > { %3158 = vmatpush3.bf16.msra.mxu0 %v3299_v32 }
 0xb3b   : > { %3159 = vmatprep.subr.bf16.mxu0 %v3497_v10 }
 0xb3e   : > { %3160 = vmatpush3.bf16.msra.mxu0 %v3300_v35 }
 0xb3f   : > { %3165 = vmatprep.subr.bf16.mxu0 (!%p2897_p11), %v3503_v61 }
 0xbf4   : > { %v2316_v30 = vpop.f32.mrb[32].mxu0  ;;  %v2372_v36 = vpop.f32.mrb[40].mxu1 }
 0xbf5   : > { %v2888_v37 = vmul.f32 -1.442695, %v2372_v36  ;;  %v3135_v39 = vpop.f32.mrb[33].mxu0  ;;  %v3143_v40 = vpop.f32.mrb[41].mxu1 }
 0xbf6   : > { %v2319_v42 = vpop.f32.mrb[34].mxu0  ;;  %v2375_v20 = vpop.f32.mrb[42].mxu1 }
 0xbf7   : > { %3355 = vpow2.f32 %v2888_v37  ;;  %v3136_v43 = vpop.f32.mrb[35].mxu0  ;;  %v3144_v38 = vpop.f32.mrb[43].mxu1 }
 0xc01   : > { %v3356_v44 = vpop.eup %3355 }
 0xc02   : > { %v2381_v45 = vadd.f32 1.0, %v3356_v44 }
 0xc04   : > { %3357 = vrcp.f32 %v2381_v45 }
 0xc0e   : > { %v3358_v47 = vpop.eup %3357 }
 0xc0f   : > { %v2384_v25 = vmul.f32 %v3358_v47, %v2372_v36 }
 0xc11   : > { %v2385_v48 = vmul.f32 %v2384_v25, %v2316_v30 }
 0xc13   : > { %v2386_v10 = vpack.c.bf16 %v2385_v48, %v2385_v48 }
 0xc15   : > { %3162 = vmatmul.mubr.bf16.vlgmr.msra.gmra.mrb[36].mxu0 %v2386_v10 }
 0xc16   : > { %3169 = vmatprep.mubr.msk.bf16.mxu0 (!%p2897_p11), %vm3504_vm2, %v3503_v61  ;;  %3166 = vmatpush3.bf16.msra.mxu0 (!%p2897_p11), %v3360_v46 }
 0xc17   : > { %3167 = vmatprep.subr.bf16.mxu0 (!%p2897_p11), %v3503_v61 }
 0xc1a   : > { %3168 = vmatpush3.bf16.msra.mxu0 (!%p2897_p11), %v3361_v62 }
 0xce5   : > { %2496 = sbr.rel (%p2897_p11) target bundleno = 3991 (0xf97), region = 108 }
 0xce8   : > { %v2485_v49 = vpop.f32.mrb[36].mxu0 }
 0xce9   : > { %v2491_v50 = vadd.f32 %v2485_v49, %v4136_v4  ;;  %v3163_v51 = vpop.f32.mrb[37].mxu0  ;;  %v2898_v4 = vld [vmem:[%s4337_s5] ss:$0 sm:$0xff] (!%p2897_p11) }
 0xcea   : > { %v2488_v52 = vpop.f32.mrb[38].mxu0 }
 0xceb   : > { %2492 = vst.msk [vmem:[%s3800_s1] sm:$0xff] %vm852_vm1, %v2491_v50  ;;  %v3164_v33 = vpop.f32.mrb[39].mxu0  ;;  %v2498_v53 = vsel (!%p2897_p11), %vm852_vm1, %v2491_v50, -inf }
 0xcec   : > { %2499 = vmax.xlane.f32.xlu0 %v2498_v53 }
 0xd79   : > { %v2500_v34 = vpop.xlane.xlu0 %2499 }
 0xd7a   : > { %3362 = vrcp.f32 %v2500_v34 }
 0xd84   : > { %v3363_v41 = vpop.eup %3362 }
 0xd85   : > { %v2502_v29 = vmul.f32 %v3363_v41, %v2491_v50 }
 0xd87   : > { %v2503_v54 = vsel %vm852_vm1, %v2502_v29, 0.0 }
 0xd88   : > { %2504 = vadd.xlane.f32.xlu0 %v2503_v54 }
 0xe15   : > { %v2505_v55 = vpop.xlane.xlu0 %2504 }
 0xe16   : > { %v2506_v56 = vmul.f32 0.03125, %v2505_v55 }
 0xe18   : > { %v2507_v57 = vsub.f32 %v2502_v29, %v2506_v56 }
 0xe1a   : > { %v2508_v58 = vmul.f32 %v2507_v57, %v2507_v57 }
 0xe1c   : > { %v2509_v59 = vsel %vm852_vm1, %v2508_v58, 0.0 }
 0xe1d   : > { %2510 = vadd.xlane.f32.xlu1 %v2509_v59 }
 0xeaa   : > { %v2511_v63 = vpop.xlane.xlu1 %2510 }
 0xeab   : > { %v2512_v0 = vmul.f32 0.03125, %v2511_v63 }
 0xead   : > { %v2513_v1 = vadd.f32 1e-05, %v2512_v0 }
 0xeaf   : > { %3364 = vrsqrt.f32 %v2513_v1 }
 0xeb9   : > { %v3365_v3 = vpop.eup %3364 }
 0xeba   : > { %v2515_v5 = vmul.f32 %v3365_v3, %v2507_v57 }
 0xebc   : > { %v2522_v6 = vmul.f32 %v2898_v4, %v2515_v5 }
 0xebe   : > { %v2523_v2 = vpack.c.bf16 %v2522_v6, %v2522_v6 }
 0xec0   : > { %3170 = vmatmul.mubr.msk.bf16.vlgmr.msra.gmra.mrb[0].mxu0 %vm852_vm1, %v2523_v2 }
 0xf93   : > { %v2577_v7 = vpop.f32.mrb[0].mxu0 }
 0xf94   : > { %2583 = vst.msk [vmem:[%s3800_s1] sm:$0xff] %vm852_vm1, %v2577_v7  ;;  %v3171_v8 = vpop.f32.mrb[1].mxu0 }
 0xf95   : > { %v2580_v9 = vpop.f32.mrb[2].mxu0 }
 0xf96   : > { %v3172_v11 = vpop.f32.mrb[3].mxu0 }
 0xf97 PF: > { %s4338_s6 = sld [smem:[#allocation11_spill]]  ;;  %s4339_s26 = sld [smem:[#allocation20_spill]] }
 0xf98   : > { %s4340_s24 = sld [smem:[#allocation17_spill]]  ;;  %s4341_s27 = sld [smem:[#allocation34_spill]] }
 0xf99   : > { %s2598_s25 = sshll.u32 %s3800_s1, 4  ;;  %s3505_s0 = smov [#allocation5]   ;;  %s2599_s25 = int_to_ptr.vmem [resolvable:$true] %s2598_s25 }
 0xf9a   : > { %s3396_s22 = scalar_lea.vmem %s2599_s25, 128  ;;  %s3400_s30 = sshll.u32 %s3505_s0, 4  ;;  %s3401_s30 = int_to_ptr.vmem [resolvable:$false] %s3400_s30 }
 0xf9b   : > { %p3397_p0 = scmp.ne.s32.totalorder %s2599_s25, %s3396_s22  ;;  %s3402_s8 = scalar_lea.vmem %s3401_s30, 256 }
 0xf9c   : > { %p3403_p6 = scmp.lt.s32.totalorder %s2599_s25, %s3401_s30  ;;  %p3404_p3 = scmp.lt.s32.totalorder %s3402_s8, %s3396_s22 }
 0xf9d   : > { %s2903_s19 = sshll.u32 %s4338_s6, 7  ;;  %s2585_s3 = scalar_lea.sflag [#allocation4], %s4339_s26 }
 0xf9e   : > { %s4196_s2 = scalar_lea.hbm %s4341_s27, %s2903_s19  ;;  %p4342_p7 = scmp.ne.s32.totalorder %s4340_s24, 0 }
 0xf9f   : > { %p3405_p8 = por %p3404_p3, %p3403_p6 }
 0xfa0   : > { %p3398_p13 = pnand %p3397_p0, %p4342_p7 }
 0xfa2   : > { %p3399_p4 = pneg %p3398_p13 }
 0xfa4   : > { %p3406_p12 = pnand %p3405_p8, %p3399_p4 }
 0xfa6   : > { %3409 = shalt.err (!%p3406_p12)
}
 0xfa7   : > { %s3410_s1 = scalar_lea.hbm %s4196_s2, 128  ;;  %s3414_s29 = scalar_lea.hbm %s4341_s27, 256 }
 0xfa8   : > { %p3411_p1 = scmp.ne.s32.totalorder %s4196_s2, %s3410_s1  ;;  %p3415_p10 = scmp.lt.u32.totalorder %s4196_s2, %s4341_s27 }
 0xfa9   : > { %p3416_p9 = scmp.lt.u32.totalorder %s3414_s29, %s3410_s1  ;;  %p3418_p0 = scmp.lt.u32.totalorder %s3410_s1, %s4196_s2 }
 0xfaa   : > { %p3412_p2 = pnand %p3411_p1, %p4342_p7 }
 0xfab   : > { %p3417_p11 = por %p3416_p9, %p3415_p10 }
 0xfac   : > { %p3413_p5 = pneg %p3412_p2 }
 0xfad   : > { %p3419_p13 = por %p3418_p0, %p3417_p11 }
 0xfaf   : > { %p3420_p4 = pnand %p3419_p13, %p3413_p5 }
 0xfb1   : > { %3423 = shalt.err (!%p3420_p4)
}
 0xfb2   : > { %3175 = dma.vmem_to_hbm [thread:$0]  (%p4342_p7), %s2599_s25, 128, %s4196_s2, %s2585_s3  }
 0xfb3 PF: > { %s4343_s5 = sld [smem:[#allocation14_spill]]  ;;  %s4344_s6 = sld [smem:[#allocation8_spill]] }
 0xfb4   : > { %s4345_s26 = sld [smem:[#allocation18_spill]] }
 0xfb9   : > { %p3186_p6 = scmp.ge.s32.totalorder %s4343_s5, 2  ;;  %s2610_s19 = sand.u32 1, %s4344_s6  }
 0xfba   : > { %p4346_p3 = scmp.ne.s32.totalorder %s4345_s26, 0  ;;  %s2611_s4 = scalar_lea.sflag [#allocation4], %s2610_s19 }
 0xfbc   : > { %p3182_p8 = pnand %p3186_p6, %p4346_p3 }
 0xfbe   : > { %3461 = dma.done.wait (!%p3182_p8), %s2611_s4, 128  }
 0xfbf   : > { %3463 = vsyncadd (!%p3182_p8), %s2611_s4, 4294967168  ;;  %s35_s23 = sadd.s32 1, %s4343_s5   ;;  %s4347_s0 = sld [smem:[#allocation9_spill]] }
 0xfc0   : > { %p32_p12 = scmp.ge.s32.totalorder %s35_s23, 6   ;;  %s4348_s30 = sld [smem:[#allocation10_spill]] }
 0xfc1   : > { %s4349_s20 = sld [smem:[#allocation19_spill]]  ;;  %s4350_s21 = sld [smem:[#allocation12_spill]] }
 0xfc2   : > { %s4351_s1 = sld [smem:[#allocation13_spill]]  ;;  %s4352_s22 = sld [smem:[#allocation15_spill]] }
 0xfc3   : > { %s4353_s2 = sld [smem:[#allocation16_spill]]  ;;  %34 = sbr.rel (!%p32_p12) target bundleno = 21 (0x15), region = 185 }
 0xfca   :  { %2616 = vsyncpa [#allocation3], 1 }
 0xfcb   :  { %2618 = vsyncpa [#allocation3 + $0x1], 1 }
 0xfcc   :  { %2619 = vsyncpa [#allocation4], 1 }
 0xfcd   :  { %2621 = vsyncpa [#allocation4 + $0x1], 1 }

</bundles_post_ra>
